<compile_context>
chip_gen: v5e
topology: v5e:2x2
jax: 0.10.0
libtpu: 0.0.40
codegen_flags: <defaults>
</compile_context>

<pallas_src>
import jax
import jax.numpy as jnp
from jax.experimental import pallas as pl
from jax.experimental.pallas import tpu as pltpu

# ---- small synthetic config --------------------------------------------------
B, S = 2, 8            # batch, sequence length
D = 32                 # synthetic bert hidden size
H = 2                  # attention heads
HD = D // H            # head dim
FFN = 4 * D            # FFN intermediate size
NF = 8                 # num_features
VOCAB = 64
LN_EPS = 1e-12
BN_EPS = 1e-5
CLS_DIMS = [D + NF, 768, 384, 128, 32, 1]   # classifier layer sizes (as in module)

# ---- packed-parameter layouts (static, shared by prepare_params & kernel) ----
# Small f32 vectors: one (1, VSLAB) slab, every segment starts on a 128-lane
# boundary so in-kernel slices are lane-aligned.
_VEC_PARAMS = [
    ("emb_ln_g", D), ("emb_ln_b", D), ("bqkv", 3 * D), ("bo", D),
    ("ln1_g", D), ("ln1_b", D), ("b1", FFN), ("b2", D),
    ("ln2_g", D), ("ln2_b", D), ("fs", NF), ("ft", NF),
    ("b0", 768), ("cb1", 384), ("cb2", 128), ("cb3", 32), ("cb4", 1),
    ("cw4", 32),
]
VOFF = {}
_o = 0
for _n, _sz in _VEC_PARAMS:
    VOFF[_n] = _o
    _o += ((_sz + 127) // 128) * 128
VSLAB = _o

# Small / 128-lane weights: one (WROWS, 128) bf16 slab, every segment starts on
# a 16-row boundary (bf16 sublane tile) so in-kernel row slices are aligned.
_W_PARAMS = [                       # (name, rows_in_slab, cols)
    ("word_emb", VOCAB, D),
    ("pos_emb", 16, D),             # actual S=8 rows, padded to 16
    ("wqkv", D, 3 * D),
    ("wo", D, D),
    ("w1", D, FFN),
    ("w2", FFN, D),
    ("cw2", 384, 128),
    ("cw3", 128, 32),
]
WOFF = {}
_r = 0
for _n, _rows, _cols in _W_PARAMS:
    WOFF[_n] = _r
    _r += _rows
WROWS = _r


def _ln(x, g, b):
    mu = jnp.mean(x, axis=-1, keepdims=True)
    var = jnp.mean((x - mu) ** 2, axis=-1, keepdims=True)
    return (x - mu) * jax.lax.rsqrt(var + LN_EPS) * g + b


def _erf(x):
    # Abramowitz & Stegun 7.1.26 rational approximation, |err| < 1.5e-7
    # (float32-level exact); avoids depending on a lax.erf lowering.
    p = 0.3275911
    a1, a2, a3, a4, a5 = (0.254829592, -0.284496736, 1.421413741,
                          -1.453152027, 1.061405429)
    ax = jnp.abs(x)
    t = 1.0 / (1.0 + p * ax)
    poly = ((((a5 * t + a4) * t + a3) * t + a2) * t + a1) * t
    y = 1.0 - poly * jnp.exp(-ax * ax)
    return jnp.where(x < 0.0, -y, y)


def _gelu_erf(x):
    # erf-exact GELU (matches torch.nn.GELU() default)
    return 0.5 * x * (1.0 + _erf(x * 0.7071067811865476))


# ---- fused Pallas kernel: embeddings -> encoder layer -> classifier ----------
def fused_kernel(ids_ref, mask_ref, feat_ref, vslab_ref, wslab_ref,
                 w0c_ref, w0f_ref, cw1_ref, out_ref):
    bf = jnp.bfloat16
    f32 = jnp.float32

    def vec(name, n):                       # (1, n) f32, lane-aligned slice
        o = VOFF[name]
        return vslab_ref[:, o:o + n]

    def wgt(name, rows, cols):              # (rows, cols) bf16, 16-row aligned
        r = WOFF[name]
        return wslab_ref[r:r + rows, 0:cols]

    # ---- embeddings: one-hot gather on the MXU (bf16 operands, f32 acc) -----
    ids = ids_ref[...]                                             # (B*S, 1) i32
    onehot = (ids == jax.lax.broadcasted_iota(jnp.int32, (B * S, VOCAB), 1))
    onehot = onehot.astype(f32).astype(bf)                         # (B*S, VOCAB)
    x = jnp.dot(onehot, wgt("word_emb", VOCAB, D),
                preferred_element_type=f32)                        # (B*S, D)
    pos = wgt("pos_emb", S, D).astype(f32)                         # (S, D)
    x = x + jnp.concatenate([pos] * B, axis=0)
    x = _ln(x, vec("emb_ln_g", D), vec("emb_ln_b", D))

    # ---- self-attention: fused QKV; batch & heads unrolled as 2-D dots ------
    qkv = jnp.dot(x.astype(bf), wgt("wqkv", D, 3 * D),
                  preferred_element_type=f32) + vec("bqkv", 3 * D)  # (B*S, 3D)
    neg = (mask_ref[...] - 1.0) * 1e9                               # (B, S)
    scale = 1.0 / (HD ** 0.5)
    ctx_b = []
    for b in range(B):
        r0 = b * S
        m_b = neg[b:b + 1, :]                                       # (1, S)
        ctx_h = []
        for h in range(H):
            c = h * HD
            q = qkv[r0:r0 + S, c:c + HD]                            # (S, HD) f32
            k = qkv[r0:r0 + S, D + c:D + c + HD]
            v = qkv[r0:r0 + S, 2 * D + c:2 * D + c + HD]
            s = jnp.dot(q, k.T, preferred_element_type=f32) * scale + m_b
            s = s - jnp.max(s, axis=-1, keepdims=True)
            p = jnp.exp(s)
            p = p * pl.reciprocal(jnp.sum(p, axis=-1, keepdims=True), approx=True)
            ctx_h.append(jnp.dot(p, v, preferred_element_type=f32))  # (S, HD)
        ctx_b.append(jnp.concatenate(ctx_h, axis=1))                # (S, D)
    ctx = jnp.concatenate(ctx_b, axis=0)                            # (B*S, D)

    attn = jnp.dot(ctx.astype(bf), wgt("wo", D, D),
                   preferred_element_type=f32) + vec("bo", D)
    h1 = _ln(x + attn, vec("ln1_g", D), vec("ln1_b", D))

    ff = jnp.dot(h1.astype(bf), wgt("w1", D, FFN),
                 preferred_element_type=f32) + vec("b1", FFN)
    ff = _gelu_erf(ff)
    ff = jnp.dot(ff.astype(bf), wgt("w2", FFN, D),
                 preferred_element_type=f32) + vec("b2", D)
    h2 = _ln(h1 + ff, vec("ln2_g", D), vec("ln2_b", D))

    # ---- [CLS] rows + feature BatchNorm (folded, eval mode) -----------------
    cls = jnp.concatenate([h2[b * S:b * S + 1, :] for b in range(B)], axis=0)  # (B, D)
    featn = feat_ref[...] * vec("fs", NF) + vec("ft", NF)                      # (B, NF)

    # ---- classifier MLP on the whole batch (BNs folded, dropout=identity) ---
    # cat([cls, featn], dim=1) @ W0  ==  cls @ W0[:D] + featn @ W0[D:]
    z = (jnp.dot(cls.astype(bf), w0c_ref[...], preferred_element_type=f32)
         + jnp.dot(featn.astype(bf), w0f_ref[...], preferred_element_type=f32)
         + vec("b0", 768))                                                     # (B, 768)
    z = jnp.maximum(z, 0.0)
    z = jnp.maximum(jnp.dot(z.astype(bf), cw1_ref[...],
                            preferred_element_type=f32) + vec("cb1", 384), 0.0)
    z = jnp.maximum(jnp.dot(z.astype(bf), wgt("cw2", 384, 128),
                            preferred_element_type=f32) + vec("cb2", 128), 0.0)
    z = jnp.maximum(jnp.dot(z.astype(bf), wgt("cw3", 128, 32),
                            preferred_element_type=f32) + vec("cb3", 32), 0.0)
    # final Linear(32, 1) as a lane reduction (f32)
    logit = jnp.sum(z * vec("cw4", 32), axis=-1, keepdims=True) + vec("cb4", 1)  # (B, 1)
    out_ref[...] = jax.nn.sigmoid(logit).reshape(1, B)               # lane-dense store


# ---- one-time parameter preparation (hoisted out of the forward path) --------
def _fold_linear_bn(W, b, g, beta, rm, rv):
    sc = g / jnp.sqrt(rv + BN_EPS)
    return W * sc[None, :], (b - rm) * sc + beta


def _pack_vec(pieces):
    parts = []
    for name, size in _VEC_PARAMS:
        a = pieces[name].reshape(-1).astype(jnp.float32)
        assert a.shape[0] == size, name
        pad = ((size + 127) // 128) * 128 - size
        parts.append(jnp.pad(a, (0, pad)))
    return jnp.concatenate(parts).reshape(1, -1)


def _pack_w(pieces):
    parts = []
    for name, rows, cols in _W_PARAMS:
        a = pieces[name].astype(jnp.bfloat16)
        parts.append(jnp.pad(a, ((0, rows - a.shape[0]), (0, 128 - a.shape[1]))))
    return jnp.concatenate(parts, axis=0)


def prepare_params(p):
    """Fold eval-mode BatchNorms, fuse QKV, pack small params into two slabs,
    cast matmul weights to bf16.  Run ONCE; result is fed to every forward."""
    fs = p['fbn_g'] / jnp.sqrt(p['fbn_rv'] + BN_EPS)
    ft = p['fbn_b'] - p['fbn_rm'] * fs

    cls_w, cls_b = [], []
    for i in range(4):
        W, b = _fold_linear_bn(p[f'cw{i}'], p[f'cb{i}'],
                               p[f'cbn{i}_g'], p[f'cbn{i}_b'],
                               p[f'cbn{i}_rm'], p[f'cbn{i}_rv'])
        cls_w.append(W); cls_b.append(b)
    cls_w.append(p['cw4']); cls_b.append(p['cb4'])

    vslab = _pack_vec({
        'emb_ln_g': p['emb_ln_g'], 'emb_ln_b': p['emb_ln_b'],
        'bqkv': jnp.concatenate([p['bq'], p['bk'], p['bv']]),
        'bo': p['bo'], 'ln1_g': p['ln1_g'], 'ln1_b': p['ln1_b'],
        'b1': p['ffn_b1'], 'b2': p['ffn_b2'],
        'ln2_g': p['ln2_g'], 'ln2_b': p['ln2_b'],
        'fs': fs, 'ft': ft,
        'b0': cls_b[0], 'cb1': cls_b[1], 'cb2': cls_b[2], 'cb3': cls_b[3],
        'cb4': cls_b[4], 'cw4': cls_w[4].reshape(-1),
    })
    wslab = _pack_w({
        'word_emb': p['word_emb'], 'pos_emb': p['pos_emb'],
        'wqkv': jnp.concatenate([p['wq'], p['wk'], p['wv']], axis=1),
        'wo': p['wo'], 'w1': p['ffn_w1'], 'w2': p['ffn_w2'],
        'cw2': cls_w[2], 'cw3': cls_w[3],
    })

    bf = jnp.bfloat16
    w0 = cls_w[0]
    return (vslab, wslab,
            w0[:D, :].astype(bf),        # (D, 768)
            w0[D:, :].astype(bf),        # (NF, 768)
            cls_w[1].astype(bf))         # (768, 384)


# ---- full forward (EnhancedBERTClassifier.forward) ---------------------------
@jax.jit
def enhanced_bert_classifier(prepped, input_ids, attention_mask, features):
    ids = input_ids.astype(jnp.int32).reshape(B * S, 1)
    mask = attention_mask.astype(jnp.float32).reshape(B, S)
    feat = features.astype(jnp.float32).reshape(B, NF)
    vslab, wslab, w0c, w0f, cw1 = prepped

    # Grid-less single invocation: whole batch + all weights in VMEM, one DMA
    # per input (8 inputs total), single lane-dense output store.
    out = pl.pallas_call(
        fused_kernel,
        out_shape=jax.ShapeDtypeStruct((1, B), jnp.float32),
    )(ids, mask, feat, vslab, wslab, w0c, w0f, cw1)
    return out.reshape(B, 1)


# ---- deterministic parameter init --------------------------------------------
def init_params(key):
    ks = list(jax.random.split(key, 64))
    it = iter(ks)
    nrm = lambda shape, s=0.02: jax.random.normal(next(it), shape, jnp.float32) * s
    p = {}
    p['word_emb'] = nrm((VOCAB, D))
    p['pos_emb'] = nrm((S, D))
    p['emb_ln_g'] = jnp.ones((D,), jnp.float32)
    p['emb_ln_b'] = jnp.zeros((D,), jnp.float32)
    for n in ('wq', 'wk', 'wv', 'wo'):
        p[n] = nrm((D, D))
    for n in ('bq', 'bk', 'bv', 'bo'):
        p[n] = jnp.zeros((D,), jnp.float32)
    p['ln1_g'] = jnp.ones((D,), jnp.float32)
    p['ln1_b'] = jnp.zeros((D,), jnp.float32)
    p['ffn_w1'] = nrm((D, FFN))
    p['ffn_b1'] = jnp.zeros((FFN,), jnp.float32)
    p['ffn_w2'] = nrm((FFN, D))
    p['ffn_b2'] = jnp.zeros((D,), jnp.float32)
    p['ln2_g'] = jnp.ones((D,), jnp.float32)
    p['ln2_b'] = jnp.zeros((D,), jnp.float32)
    # feature BatchNorm1d(num_features), eval-mode stats
    p['fbn_g'] = 1.0 + nrm((NF,), 0.1)
    p['fbn_b'] = nrm((NF,), 0.1)
    p['fbn_rm'] = nrm((NF,), 0.1)
    p['fbn_rv'] = 0.5 + jnp.abs(nrm((NF,), 0.5))
    # classifier: Linear -> BN -> ReLU (x4), final Linear(32,1)
    for i in range(5):
        din, dout = CLS_DIMS[i], CLS_DIMS[i + 1]
        p[f'cw{i}'] = nrm((din, dout))
        p[f'cb{i}'] = jnp.zeros((dout,), jnp.float32)
        if i < 4:
            p[f'cbn{i}_g'] = 1.0 + nrm((dout,), 0.1)
            p[f'cbn{i}_b'] = nrm((dout,), 0.1)
            p[f'cbn{i}_rm'] = nrm((dout,), 0.1)
            p[f'cbn{i}_rv'] = 0.5 + jnp.abs(nrm((dout,), 0.5))
    return p


if __name__ == "__main__":
    key = jax.random.PRNGKey(0)
    k_ids, k_feat, k_param = jax.random.split(key, 3)
    input_ids = jax.random.randint(k_ids, (B, S), 0, VOCAB, dtype=jnp.int32)
    attention_mask = jnp.ones((B, S), jnp.float32).at[1, 6:].set(0.0)  # some padding
    features = jax.random.normal(k_feat, (B, NF), jnp.float32)
    params = init_params(k_param)

    prepped = jax.block_until_ready(prepare_params(params))   # one-time folding/packing
    probs = enhanced_bert_classifier(prepped, input_ids, attention_mask, features)
    probs = jax.block_until_ready(probs)
    assert probs.shape == (B, 1) and probs.dtype == jnp.float32
    assert bool(jnp.all(jnp.isfinite(probs))) and bool(jnp.all((probs >= 0) & (probs <= 1)))
    print("KERNEL_OK")
</pallas_src>

<mosaic_0001>
module attributes {stable_mosaic.version = 11 : i64} {
  func.func @fused_kernel(%arg0: memref<16x1xi32, #tpu.memory_space<vmem>>, %arg1: memref<2x8xf32, #tpu.memory_space<vmem>>, %arg2: memref<2x8xf32, #tpu.memory_space<vmem>>, %arg3: memref<1x3200xf32, #tpu.memory_space<vmem>>, %arg4: memref<816x128xbf16, #tpu.memory_space<vmem>>, %arg5: memref<32x768xbf16, #tpu.memory_space<vmem>>, %arg6: memref<8x768xbf16, #tpu.memory_space<vmem>>, %arg7: memref<768x384xbf16, #tpu.memory_space<vmem>>, %arg8: memref<1x2xf32, #tpu.memory_space<vmem>>) attributes {dimension_semantics = [], scalar_prefetch = 0 : i64, scratch_operands = 0 : i64, tpu.core_type = #tpu.core_type<tc>} {
    %c0 = arith.constant 0 : index
    %c0_0 = arith.constant 0 : index
    %0 = vector.load %arg0[%c0, %c0_0] : memref<16x1xi32, #tpu.memory_space<vmem>>, vector<16x1xi32>
    %1 = tpu.iota {dimensions = array<i32: 1>} : vector<16x64xi32>
    %2 = vector.broadcast %0 : vector<16x1xi32> to vector<16x64xi32>
    %3 = arith.cmpi eq, %2, %1 : vector<16x64xi32>
    %4 = arith.extui %3 : vector<16x64xi1> to vector<16x64xi32>
    %5 = arith.sitofp %4 : vector<16x64xi32> to vector<16x64xf32>
    %6 = arith.truncf %5 : vector<16x64xf32> to vector<16x64xbf16>
    %c0_1 = arith.constant 0 : index
    %c0_2 = arith.constant 0 : index
    %7 = vector.load %arg4[%c0_1, %c0_2] : memref<816x128xbf16, #tpu.memory_space<vmem>>, vector<64x32xbf16>
    %cst = arith.constant dense<0.000000e+00> : vector<16x32xf32>
    %8 = tpu.matmul %6, %7, %cst {dimension_numbers = #tpu.dot_dimension_numbers<[1], [0], [0], [1], [0, 0, 1, 1], [], []>} : vector<16x64xbf16>, vector<64x32xbf16>, vector<16x32xf32> -> vector<16x32xf32>
    %c64 = arith.constant 64 : index
    %c0_3 = arith.constant 0 : index
    %9 = vector.load %arg4[%c64, %c0_3] : memref<816x128xbf16, #tpu.memory_space<vmem>>, vector<8x32xbf16>
    %10 = arith.extf %9 : vector<8x32xbf16> to vector<8x32xf32>
    %11 = tpu.concatenate %10, %10 in 0 : vector<8x32xf32>, vector<8x32xf32> -> vector<16x32xf32>
    %12 = arith.addf %8, %11 : vector<16x32xf32>
    %c0_4 = arith.constant 0 : index
    %c0_5 = arith.constant 0 : index
    %13 = vector.load %arg3[%c0_4, %c0_5] : memref<1x3200xf32, #tpu.memory_space<vmem>>, vector<1x32xf32>
    %c0_6 = arith.constant 0 : index
    %c128 = arith.constant 128 : index
    %14 = vector.load %arg3[%c0_6, %c128] : memref<1x3200xf32, #tpu.memory_space<vmem>>, vector<1x32xf32>
    %cst_7 = arith.constant dense<0.000000e+00> : vector<16xf32>
    %15 = vector.multi_reduction <add>, %12, %cst_7 [1] : vector<16x32xf32> to vector<16xf32>
    %16 = vector.shape_cast %15 : vector<16xf32> to vector<16x1xf32>
    %cst_8 = arith.constant 3.200000e+01 : f32
    %17 = vector.broadcast %cst_8 : f32 to vector<16x1xf32>
    %18 = arith.divf %16, %17 : vector<16x1xf32>
    %19 = vector.broadcast %18 : vector<16x1xf32> to vector<16x32xf32>
    %20 = arith.subf %12, %19 : vector<16x32xf32>
    %21 = arith.mulf %20, %20 : vector<16x32xf32>
    %cst_9 = arith.constant dense<0.000000e+00> : vector<16xf32>
    %22 = vector.multi_reduction <add>, %21, %cst_9 [1] : vector<16x32xf32> to vector<16xf32>
    %23 = vector.shape_cast %22 : vector<16xf32> to vector<16x1xf32>
    %cst_10 = arith.constant 3.200000e+01 : f32
    %24 = vector.broadcast %cst_10 : f32 to vector<16x1xf32>
    %25 = arith.divf %23, %24 : vector<16x1xf32>
    %26 = vector.broadcast %18 : vector<16x1xf32> to vector<16x32xf32>
    %27 = arith.subf %12, %26 : vector<16x32xf32>
    %cst_11 = arith.constant 9.99999996E-13 : f32
    %28 = vector.broadcast %cst_11 : f32 to vector<16x1xf32>
    %29 = arith.addf %25, %28 : vector<16x1xf32>
    %30 = math.rsqrt %29 : vector<16x1xf32>
    %31 = vector.broadcast %30 : vector<16x1xf32> to vector<16x32xf32>
    %32 = arith.mulf %27, %31 : vector<16x32xf32>
    %33 = vector.broadcast %13 : vector<1x32xf32> to vector<16x32xf32>
    %34 = arith.mulf %32, %33 : vector<16x32xf32>
    %35 = vector.broadcast %14 : vector<1x32xf32> to vector<16x32xf32>
    %36 = arith.addf %34, %35 : vector<16x32xf32>
    %37 = arith.truncf %36 : vector<16x32xf32> to vector<16x32xbf16>
    %c80 = arith.constant 80 : index
    %c0_12 = arith.constant 0 : index
    %38 = vector.load %arg4[%c80, %c0_12] : memref<816x128xbf16, #tpu.memory_space<vmem>>, vector<32x96xbf16>
    %cst_13 = arith.constant dense<0.000000e+00> : vector<16x96xf32>
    %39 = tpu.matmul %37, %38, %cst_13 {dimension_numbers = #tpu.dot_dimension_numbers<[1], [0], [0], [1], [0, 0, 1, 1], [], []>} : vector<16x32xbf16>, vector<32x96xbf16>, vector<16x96xf32> -> vector<16x96xf32>
    %c0_14 = arith.constant 0 : index
    %c256 = arith.constant 256 : index
    %40 = vector.load %arg3[%c0_14, %c256] : memref<1x3200xf32, #tpu.memory_space<vmem>>, vector<1x96xf32>
    %41 = vector.broadcast %40 : vector<1x96xf32> to vector<16x96xf32>
    %42 = arith.addf %39, %41 : vector<16x96xf32>
    %c0_15 = arith.constant 0 : index
    %c0_16 = arith.constant 0 : index
    %43 = vector.load %arg1[%c0_15, %c0_16] : memref<2x8xf32, #tpu.memory_space<vmem>>, vector<2x8xf32>
    %cst_17 = arith.constant 1.000000e+00 : f32
    %44 = vector.broadcast %cst_17 : f32 to vector<2x8xf32>
    %45 = arith.subf %43, %44 : vector<2x8xf32>
    %cst_18 = arith.constant 1.000000e+09 : f32
    %46 = vector.broadcast %cst_18 : f32 to vector<2x8xf32>
    %47 = arith.mulf %45, %46 : vector<2x8xf32>
    %48 = vector.extract_strided_slice %47 {offsets = [0, 0], sizes = [1, 8], strides = [1, 1]} : vector<2x8xf32> to vector<1x8xf32>
    %49 = vector.extract_strided_slice %42 {offsets = [0, 0], sizes = [8, 16], strides = [1, 1]} : vector<16x96xf32> to vector<8x16xf32>
    %50 = vector.extract_strided_slice %42 {offsets = [0, 32], sizes = [8, 16], strides = [1, 1]} : vector<16x96xf32> to vector<8x16xf32>
    %51 = vector.extract_strided_slice %42 {offsets = [0, 64], sizes = [8, 16], strides = [1, 1]} : vector<16x96xf32> to vector<8x16xf32>
    %52 = tpu.transpose %50, [1, 0] : vector<8x16xf32> -> vector<16x8xf32>
    %cst_19 = arith.constant dense<0.000000e+00> : vector<8x8xf32>
    %53 = tpu.matmul %49, %52, %cst_19 {dimension_numbers = #tpu.dot_dimension_numbers<[1], [0], [0], [1], [0, 0, 1, 1], [], []>} : vector<8x16xf32>, vector<16x8xf32>, vector<8x8xf32> -> vector<8x8xf32>
    %cst_20 = arith.constant 2.500000e-01 : f32
    %54 = vector.broadcast %cst_20 : f32 to vector<8x8xf32>
    %55 = arith.mulf %53, %54 : vector<8x8xf32>
    %56 = vector.broadcast %48 : vector<1x8xf32> to vector<8x8xf32>
    %57 = arith.addf %55, %56 : vector<8x8xf32>
    %cst_21 = arith.constant dense<0xFF800000> : vector<8xf32>
    %58 = vector.multi_reduction <maximumf>, %57, %cst_21 [1] : vector<8x8xf32> to vector<8xf32>
    %59 = vector.shape_cast %58 : vector<8xf32> to vector<8x1xf32>
    %60 = vector.broadcast %59 : vector<8x1xf32> to vector<8x8xf32>
    %61 = arith.subf %57, %60 : vector<8x8xf32>
    %62 = math.exp %61 : vector<8x8xf32>
    %cst_22 = arith.constant dense<0.000000e+00> : vector<8xf32>
    %63 = vector.multi_reduction <add>, %62, %cst_22 [1] : vector<8x8xf32> to vector<8xf32>
    %64 = vector.shape_cast %63 : vector<8xf32> to vector<8x1xf32>
    %65 = tpu.reciprocal %64 {approx = true} : vector<8x1xf32> -> vector<8x1xf32>
    %66 = vector.broadcast %65 : vector<8x1xf32> to vector<8x8xf32>
    %67 = arith.mulf %62, %66 : vector<8x8xf32>
    %cst_23 = arith.constant dense<0.000000e+00> : vector<8x16xf32>
    %68 = tpu.matmul %67, %51, %cst_23 {dimension_numbers = #tpu.dot_dimension_numbers<[1], [0], [0], [1], [0, 0, 1, 1], [], []>} : vector<8x8xf32>, vector<8x16xf32>, vector<8x16xf32> -> vector<8x16xf32>
    %69 = vector.extract_strided_slice %42 {offsets = [0, 16], sizes = [8, 16], strides = [1, 1]} : vector<16x96xf32> to vector<8x16xf32>
    %70 = vector.extract_strided_slice %42 {offsets = [0, 48], sizes = [8, 16], strides = [1, 1]} : vector<16x96xf32> to vector<8x16xf32>
    %71 = vector.extract_strided_slice %42 {offsets = [0, 80], sizes = [8, 16], strides = [1, 1]} : vector<16x96xf32> to vector<8x16xf32>
    %72 = tpu.transpose %70, [1, 0] : vector<8x16xf32> -> vector<16x8xf32>
    %cst_24 = arith.constant dense<0.000000e+00> : vector<8x8xf32>
    %73 = tpu.matmul %69, %72, %cst_24 {dimension_numbers = #tpu.dot_dimension_numbers<[1], [0], [0], [1], [0, 0, 1, 1], [], []>} : vector<8x16xf32>, vector<16x8xf32>, vector<8x8xf32> -> vector<8x8xf32>
    %cst_25 = arith.constant 2.500000e-01 : f32
    %74 = vector.broadcast %cst_25 : f32 to vector<8x8xf32>
    %75 = arith.mulf %73, %74 : vector<8x8xf32>
    %76 = vector.broadcast %48 : vector<1x8xf32> to vector<8x8xf32>
    %77 = arith.addf %75, %76 : vector<8x8xf32>
    %cst_26 = arith.constant dense<0xFF800000> : vector<8xf32>
    %78 = vector.multi_reduction <maximumf>, %77, %cst_26 [1] : vector<8x8xf32> to vector<8xf32>
    %79 = vector.shape_cast %78 : vector<8xf32> to vector<8x1xf32>
    %80 = vector.broadcast %79 : vector<8x1xf32> to vector<8x8xf32>
    %81 = arith.subf %77, %80 : vector<8x8xf32>
    %82 = math.exp %81 : vector<8x8xf32>
    %cst_27 = arith.constant dense<0.000000e+00> : vector<8xf32>
    %83 = vector.multi_reduction <add>, %82, %cst_27 [1] : vector<8x8xf32> to vector<8xf32>
    %84 = vector.shape_cast %83 : vector<8xf32> to vector<8x1xf32>
    %85 = tpu.reciprocal %84 {approx = true} : vector<8x1xf32> -> vector<8x1xf32>
    %86 = vector.broadcast %85 : vector<8x1xf32> to vector<8x8xf32>
    %87 = arith.mulf %82, %86 : vector<8x8xf32>
    %cst_28 = arith.constant dense<0.000000e+00> : vector<8x16xf32>
    %88 = tpu.matmul %87, %71, %cst_28 {dimension_numbers = #tpu.dot_dimension_numbers<[1], [0], [0], [1], [0, 0, 1, 1], [], []>} : vector<8x8xf32>, vector<8x16xf32>, vector<8x16xf32> -> vector<8x16xf32>
    %89 = tpu.concatenate %68, %88 in 1 : vector<8x16xf32>, vector<8x16xf32> -> vector<8x32xf32>
    %90 = vector.extract_strided_slice %47 {offsets = [1, 0], sizes = [1, 8], strides = [1, 1]} : vector<2x8xf32> to vector<1x8xf32>
    %91 = vector.extract_strided_slice %42 {offsets = [8, 0], sizes = [8, 16], strides = [1, 1]} : vector<16x96xf32> to vector<8x16xf32>
    %92 = vector.extract_strided_slice %42 {offsets = [8, 32], sizes = [8, 16], strides = [1, 1]} : vector<16x96xf32> to vector<8x16xf32>
    %93 = vector.extract_strided_slice %42 {offsets = [8, 64], sizes = [8, 16], strides = [1, 1]} : vector<16x96xf32> to vector<8x16xf32>
    %94 = tpu.transpose %92, [1, 0] : vector<8x16xf32> -> vector<16x8xf32>
    %cst_29 = arith.constant dense<0.000000e+00> : vector<8x8xf32>
    %95 = tpu.matmul %91, %94, %cst_29 {dimension_numbers = #tpu.dot_dimension_numbers<[1], [0], [0], [1], [0, 0, 1, 1], [], []>} : vector<8x16xf32>, vector<16x8xf32>, vector<8x8xf32> -> vector<8x8xf32>
    %cst_30 = arith.constant 2.500000e-01 : f32
    %96 = vector.broadcast %cst_30 : f32 to vector<8x8xf32>
    %97 = arith.mulf %95, %96 : vector<8x8xf32>
    %98 = vector.broadcast %90 : vector<1x8xf32> to vector<8x8xf32>
    %99 = arith.addf %97, %98 : vector<8x8xf32>
    %cst_31 = arith.constant dense<0xFF800000> : vector<8xf32>
    %100 = vector.multi_reduction <maximumf>, %99, %cst_31 [1] : vector<8x8xf32> to vector<8xf32>
    %101 = vector.shape_cast %100 : vector<8xf32> to vector<8x1xf32>
    %102 = vector.broadcast %101 : vector<8x1xf32> to vector<8x8xf32>
    %103 = arith.subf %99, %102 : vector<8x8xf32>
    %104 = math.exp %103 : vector<8x8xf32>
    %cst_32 = arith.constant dense<0.000000e+00> : vector<8xf32>
    %105 = vector.multi_reduction <add>, %104, %cst_32 [1] : vector<8x8xf32> to vector<8xf32>
    %106 = vector.shape_cast %105 : vector<8xf32> to vector<8x1xf32>
    %107 = tpu.reciprocal %106 {approx = true} : vector<8x1xf32> -> vector<8x1xf32>
    %108 = vector.broadcast %107 : vector<8x1xf32> to vector<8x8xf32>
    %109 = arith.mulf %104, %108 : vector<8x8xf32>
    %cst_33 = arith.constant dense<0.000000e+00> : vector<8x16xf32>
    %110 = tpu.matmul %109, %93, %cst_33 {dimension_numbers = #tpu.dot_dimension_numbers<[1], [0], [0], [1], [0, 0, 1, 1], [], []>} : vector<8x8xf32>, vector<8x16xf32>, vector<8x16xf32> -> vector<8x16xf32>
    %111 = vector.extract_strided_slice %42 {offsets = [8, 16], sizes = [8, 16], strides = [1, 1]} : vector<16x96xf32> to vector<8x16xf32>
    %112 = vector.extract_strided_slice %42 {offsets = [8, 48], sizes = [8, 16], strides = [1, 1]} : vector<16x96xf32> to vector<8x16xf32>
    %113 = vector.extract_strided_slice %42 {offsets = [8, 80], sizes = [8, 16], strides = [1, 1]} : vector<16x96xf32> to vector<8x16xf32>
    %114 = tpu.transpose %112, [1, 0] : vector<8x16xf32> -> vector<16x8xf32>
    %cst_34 = arith.constant dense<0.000000e+00> : vector<8x8xf32>
    %115 = tpu.matmul %111, %114, %cst_34 {dimension_numbers = #tpu.dot_dimension_numbers<[1], [0], [0], [1], [0, 0, 1, 1], [], []>} : vector<8x16xf32>, vector<16x8xf32>, vector<8x8xf32> -> vector<8x8xf32>
    %cst_35 = arith.constant 2.500000e-01 : f32
    %116 = vector.broadcast %cst_35 : f32 to vector<8x8xf32>
    %117 = arith.mulf %115, %116 : vector<8x8xf32>
    %118 = vector.broadcast %90 : vector<1x8xf32> to vector<8x8xf32>
    %119 = arith.addf %117, %118 : vector<8x8xf32>
    %cst_36 = arith.constant dense<0xFF800000> : vector<8xf32>
    %120 = vector.multi_reduction <maximumf>, %119, %cst_36 [1] : vector<8x8xf32> to vector<8xf32>
    %121 = vector.shape_cast %120 : vector<8xf32> to vector<8x1xf32>
    %122 = vector.broadcast %121 : vector<8x1xf32> to vector<8x8xf32>
    %123 = arith.subf %119, %122 : vector<8x8xf32>
    %124 = math.exp %123 : vector<8x8xf32>
    %cst_37 = arith.constant dense<0.000000e+00> : vector<8xf32>
    %125 = vector.multi_reduction <add>, %124, %cst_37 [1] : vector<8x8xf32> to vector<8xf32>
    %126 = vector.shape_cast %125 : vector<8xf32> to vector<8x1xf32>
    %127 = tpu.reciprocal %126 {approx = true} : vector<8x1xf32> -> vector<8x1xf32>
    %128 = vector.broadcast %127 : vector<8x1xf32> to vector<8x8xf32>
    %129 = arith.mulf %124, %128 : vector<8x8xf32>
    %cst_38 = arith.constant dense<0.000000e+00> : vector<8x16xf32>
    %130 = tpu.matmul %129, %113, %cst_38 {dimension_numbers = #tpu.dot_dimension_numbers<[1], [0], [0], [1], [0, 0, 1, 1], [], []>} : vector<8x8xf32>, vector<8x16xf32>, vector<8x16xf32> -> vector<8x16xf32>
    %131 = tpu.concatenate %110, %130 in 1 : vector<8x16xf32>, vector<8x16xf32> -> vector<8x32xf32>
    %132 = tpu.concatenate %89, %131 in 0 : vector<8x32xf32>, vector<8x32xf32> -> vector<16x32xf32>
    %133 = arith.truncf %132 : vector<16x32xf32> to vector<16x32xbf16>
    %c112 = arith.constant 112 : index
    %c0_39 = arith.constant 0 : index
    %134 = vector.load %arg4[%c112, %c0_39] : memref<816x128xbf16, #tpu.memory_space<vmem>>, vector<32x32xbf16>
    %cst_40 = arith.constant dense<0.000000e+00> : vector<16x32xf32>
    %135 = tpu.matmul %133, %134, %cst_40 {dimension_numbers = #tpu.dot_dimension_numbers<[1], [0], [0], [1], [0, 0, 1, 1], [], []>} : vector<16x32xbf16>, vector<32x32xbf16>, vector<16x32xf32> -> vector<16x32xf32>
    %c0_41 = arith.constant 0 : index
    %c384 = arith.constant 384 : index
    %136 = vector.load %arg3[%c0_41, %c384] : memref<1x3200xf32, #tpu.memory_space<vmem>>, vector<1x32xf32>
    %137 = vector.broadcast %136 : vector<1x32xf32> to vector<16x32xf32>
    %138 = arith.addf %135, %137 : vector<16x32xf32>
    %139 = arith.addf %36, %138 : vector<16x32xf32>
    %c0_42 = arith.constant 0 : index
    %c512 = arith.constant 512 : index
    %140 = vector.load %arg3[%c0_42, %c512] : memref<1x3200xf32, #tpu.memory_space<vmem>>, vector<1x32xf32>
    %c0_43 = arith.constant 0 : index
    %c640 = arith.constant 640 : index
    %141 = vector.load %arg3[%c0_43, %c640] : memref<1x3200xf32, #tpu.memory_space<vmem>>, vector<1x32xf32>
    %cst_44 = arith.constant dense<0.000000e+00> : vector<16xf32>
    %142 = vector.multi_reduction <add>, %139, %cst_44 [1] : vector<16x32xf32> to vector<16xf32>
    %143 = vector.shape_cast %142 : vector<16xf32> to vector<16x1xf32>
    %cst_45 = arith.constant 3.200000e+01 : f32
    %144 = vector.broadcast %cst_45 : f32 to vector<16x1xf32>
    %145 = arith.divf %143, %144 : vector<16x1xf32>
    %146 = vector.broadcast %145 : vector<16x1xf32> to vector<16x32xf32>
    %147 = arith.subf %139, %146 : vector<16x32xf32>
    %148 = arith.mulf %147, %147 : vector<16x32xf32>
    %cst_46 = arith.constant dense<0.000000e+00> : vector<16xf32>
    %149 = vector.multi_reduction <add>, %148, %cst_46 [1] : vector<16x32xf32> to vector<16xf32>
    %150 = vector.shape_cast %149 : vector<16xf32> to vector<16x1xf32>
    %cst_47 = arith.constant 3.200000e+01 : f32
    %151 = vector.broadcast %cst_47 : f32 to vector<16x1xf32>
    %152 = arith.divf %150, %151 : vector<16x1xf32>
    %153 = vector.broadcast %145 : vector<16x1xf32> to vector<16x32xf32>
    %154 = arith.subf %139, %153 : vector<16x32xf32>
    %cst_48 = arith.constant 9.99999996E-13 : f32
    %155 = vector.broadcast %cst_48 : f32 to vector<16x1xf32>
    %156 = arith.addf %152, %155 : vector<16x1xf32>
    %157 = math.rsqrt %156 : vector<16x1xf32>
    %158 = vector.broadcast %157 : vector<16x1xf32> to vector<16x32xf32>
    %159 = arith.mulf %154, %158 : vector<16x32xf32>
    %160 = vector.broadcast %140 : vector<1x32xf32> to vector<16x32xf32>
    %161 = arith.mulf %159, %160 : vector<16x32xf32>
    %162 = vector.broadcast %141 : vector<1x32xf32> to vector<16x32xf32>
    %163 = arith.addf %161, %162 : vector<16x32xf32>
    %164 = arith.truncf %163 : vector<16x32xf32> to vector<16x32xbf16>
    %c144 = arith.constant 144 : index
    %c0_49 = arith.constant 0 : index
    %165 = vector.load %arg4[%c144, %c0_49] : memref<816x128xbf16, #tpu.memory_space<vmem>>, vector<32x128xbf16>
    %cst_50 = arith.constant dense<0.000000e+00> : vector<16x128xf32>
    %166 = tpu.matmul %164, %165, %cst_50 {dimension_numbers = #tpu.dot_dimension_numbers<[1], [0], [0], [1], [0, 0, 1, 1], [], []>} : vector<16x32xbf16>, vector<32x128xbf16>, vector<16x128xf32> -> vector<16x128xf32>
    %c0_51 = arith.constant 0 : index
    %c768 = arith.constant 768 : index
    %167 = vector.load %arg3[%c0_51, %c768] : memref<1x3200xf32, #tpu.memory_space<vmem>>, vector<1x128xf32>
    %168 = vector.broadcast %167 : vector<1x128xf32> to vector<16x128xf32>
    %169 = arith.addf %166, %168 : vector<16x128xf32>
    %cst_52 = arith.constant 5.000000e-01 : f32
    %170 = vector.broadcast %cst_52 : f32 to vector<16x128xf32>
    %171 = arith.mulf %170, %169 : vector<16x128xf32>
    %cst_53 = arith.constant 0.707106769 : f32
    %172 = vector.broadcast %cst_53 : f32 to vector<16x128xf32>
    %173 = arith.mulf %169, %172 : vector<16x128xf32>
    %174 = math.absf %173 : vector<16x128xf32>
    %cst_54 = arith.constant 0.327591091 : f32
    %175 = vector.broadcast %cst_54 : f32 to vector<16x128xf32>
    %176 = arith.mulf %175, %174 : vector<16x128xf32>
    %cst_55 = arith.constant 1.000000e+00 : f32
    %177 = vector.broadcast %cst_55 : f32 to vector<16x128xf32>
    %178 = arith.addf %177, %176 : vector<16x128xf32>
    %cst_56 = arith.constant 1.000000e+00 : f32
    %179 = vector.broadcast %cst_56 : f32 to vector<16x128xf32>
    %180 = arith.divf %179, %178 : vector<16x128xf32>
    %cst_57 = arith.constant 1.06140542 : f32
    %181 = vector.broadcast %cst_57 : f32 to vector<16x128xf32>
    %182 = arith.mulf %181, %180 : vector<16x128xf32>
    %cst_58 = arith.constant -1.45315206 : f32
    %183 = vector.broadcast %cst_58 : f32 to vector<16x128xf32>
    %184 = arith.addf %182, %183 : vector<16x128xf32>
    %185 = arith.mulf %184, %180 : vector<16x128xf32>
    %cst_59 = arith.constant 1.42141378 : f32
    %186 = vector.broadcast %cst_59 : f32 to vector<16x128xf32>
    %187 = arith.addf %185, %186 : vector<16x128xf32>
    %188 = arith.mulf %187, %180 : vector<16x128xf32>
    %cst_60 = arith.constant -0.284496725 : f32
    %189 = vector.broadcast %cst_60 : f32 to vector<16x128xf32>
    %190 = arith.addf %188, %189 : vector<16x128xf32>
    %191 = arith.mulf %190, %180 : vector<16x128xf32>
    %cst_61 = arith.constant 0.254829586 : f32
    %192 = vector.broadcast %cst_61 : f32 to vector<16x128xf32>
    %193 = arith.addf %191, %192 : vector<16x128xf32>
    %194 = arith.mulf %193, %180 : vector<16x128xf32>
    %cst_62 = arith.constant 0.000000e+00 : f32
    %195 = vector.broadcast %cst_62 : f32 to vector<16x128xf32>
    %196 = arith.subf %195, %174 : vector<16x128xf32>
    %197 = arith.mulf %196, %174 : vector<16x128xf32>
    %198 = math.exp %197 : vector<16x128xf32>
    %199 = arith.mulf %194, %198 : vector<16x128xf32>
    %cst_63 = arith.constant 1.000000e+00 : f32
    %200 = vector.broadcast %cst_63 : f32 to vector<16x128xf32>
    %201 = arith.subf %200, %199 : vector<16x128xf32>
    %cst_64 = arith.constant 0.000000e+00 : f32
    %202 = vector.broadcast %cst_64 : f32 to vector<16x128xf32>
    %203 = arith.cmpf olt, %173, %202 : vector<16x128xf32>
    %cst_65 = arith.constant 0.000000e+00 : f32
    %204 = vector.broadcast %cst_65 : f32 to vector<16x128xf32>
    %205 = arith.subf %204, %201 : vector<16x128xf32>
    %206 = arith.select %203, %205, %201 : vector<16x128xi1>, vector<16x128xf32>
    %cst_66 = arith.constant 1.000000e+00 : f32
    %207 = vector.broadcast %cst_66 : f32 to vector<16x128xf32>
    %208 = arith.addf %207, %206 : vector<16x128xf32>
    %209 = arith.mulf %171, %208 : vector<16x128xf32>
    %210 = arith.truncf %209 : vector<16x128xf32> to vector<16x128xbf16>
    %c176 = arith.constant 176 : index
    %c0_67 = arith.constant 0 : index
    %211 = vector.load %arg4[%c176, %c0_67] : memref<816x128xbf16, #tpu.memory_space<vmem>>, vector<128x32xbf16>
    %cst_68 = arith.constant dense<0.000000e+00> : vector<16x32xf32>
    %212 = tpu.matmul %210, %211, %cst_68 {dimension_numbers = #tpu.dot_dimension_numbers<[1], [0], [0], [1], [0, 0, 1, 1], [], []>} : vector<16x128xbf16>, vector<128x32xbf16>, vector<16x32xf32> -> vector<16x32xf32>
    %c0_69 = arith.constant 0 : index
    %c896 = arith.constant 896 : index
    %213 = vector.load %arg3[%c0_69, %c896] : memref<1x3200xf32, #tpu.memory_space<vmem>>, vector<1x32xf32>
    %214 = vector.broadcast %213 : vector<1x32xf32> to vector<16x32xf32>
    %215 = arith.addf %212, %214 : vector<16x32xf32>
    %216 = arith.addf %163, %215 : vector<16x32xf32>
    %c0_70 = arith.constant 0 : index
    %c1024 = arith.constant 1024 : index
    %217 = vector.load %arg3[%c0_70, %c1024] : memref<1x3200xf32, #tpu.memory_space<vmem>>, vector<1x32xf32>
    %c0_71 = arith.constant 0 : index
    %c1152 = arith.constant 1152 : index
    %218 = vector.load %arg3[%c0_71, %c1152] : memref<1x3200xf32, #tpu.memory_space<vmem>>, vector<1x32xf32>
    %cst_72 = arith.constant dense<0.000000e+00> : vector<16xf32>
    %219 = vector.multi_reduction <add>, %216, %cst_72 [1] : vector<16x32xf32> to vector<16xf32>
    %220 = vector.shape_cast %219 : vector<16xf32> to vector<16x1xf32>
    %cst_73 = arith.constant 3.200000e+01 : f32
    %221 = vector.broadcast %cst_73 : f32 to vector<16x1xf32>
    %222 = arith.divf %220, %221 : vector<16x1xf32>
    %223 = vector.broadcast %222 : vector<16x1xf32> to vector<16x32xf32>
    %224 = arith.subf %216, %223 : vector<16x32xf32>
    %225 = arith.mulf %224, %224 : vector<16x32xf32>
    %cst_74 = arith.constant dense<0.000000e+00> : vector<16xf32>
    %226 = vector.multi_reduction <add>, %225, %cst_74 [1] : vector<16x32xf32> to vector<16xf32>
    %227 = vector.shape_cast %226 : vector<16xf32> to vector<16x1xf32>
    %cst_75 = arith.constant 3.200000e+01 : f32
    %228 = vector.broadcast %cst_75 : f32 to vector<16x1xf32>
    %229 = arith.divf %227, %228 : vector<16x1xf32>
    %230 = vector.broadcast %222 : vector<16x1xf32> to vector<16x32xf32>
    %231 = arith.subf %216, %230 : vector<16x32xf32>
    %cst_76 = arith.constant 9.99999996E-13 : f32
    %232 = vector.broadcast %cst_76 : f32 to vector<16x1xf32>
    %233 = arith.addf %229, %232 : vector<16x1xf32>
    %234 = math.rsqrt %233 : vector<16x1xf32>
    %235 = vector.broadcast %234 : vector<16x1xf32> to vector<16x32xf32>
    %236 = arith.mulf %231, %235 : vector<16x32xf32>
    %237 = vector.broadcast %217 : vector<1x32xf32> to vector<16x32xf32>
    %238 = arith.mulf %236, %237 : vector<16x32xf32>
    %239 = vector.broadcast %218 : vector<1x32xf32> to vector<16x32xf32>
    %240 = arith.addf %238, %239 : vector<16x32xf32>
    %241 = vector.extract_strided_slice %240 {offsets = [0, 0], sizes = [1, 32], strides = [1, 1]} : vector<16x32xf32> to vector<1x32xf32>
    %242 = vector.extract_strided_slice %240 {offsets = [8, 0], sizes = [1, 32], strides = [1, 1]} : vector<16x32xf32> to vector<1x32xf32>
    %243 = tpu.concatenate %241, %242 in 0 : vector<1x32xf32>, vector<1x32xf32> -> vector<2x32xf32>
    %c0_77 = arith.constant 0 : index
    %c0_78 = arith.constant 0 : index
    %244 = vector.load %arg2[%c0_77, %c0_78] : memref<2x8xf32, #tpu.memory_space<vmem>>, vector<2x8xf32>
    %c0_79 = arith.constant 0 : index
    %c1280 = arith.constant 1280 : index
    %245 = vector.load %arg3[%c0_79, %c1280] : memref<1x3200xf32, #tpu.memory_space<vmem>>, vector<1x8xf32>
    %246 = vector.broadcast %245 : vector<1x8xf32> to vector<2x8xf32>
    %247 = arith.mulf %244, %246 : vector<2x8xf32>
    %c0_80 = arith.constant 0 : index
    %c1408 = arith.constant 1408 : index
    %248 = vector.load %arg3[%c0_80, %c1408] : memref<1x3200xf32, #tpu.memory_space<vmem>>, vector<1x8xf32>
    %249 = vector.broadcast %248 : vector<1x8xf32> to vector<2x8xf32>
    %250 = arith.addf %247, %249 : vector<2x8xf32>
    %251 = arith.truncf %243 : vector<2x32xf32> to vector<2x32xbf16>
    %c0_81 = arith.constant 0 : index
    %c0_82 = arith.constant 0 : index
    %252 = vector.load %arg5[%c0_81, %c0_82] : memref<32x768xbf16, #tpu.memory_space<vmem>>, vector<32x768xbf16>
    %cst_83 = arith.constant dense<0.000000e+00> : vector<2x768xf32>
    %253 = tpu.matmul %251, %252, %cst_83 {dimension_numbers = #tpu.dot_dimension_numbers<[1], [0], [0], [1], [0, 0, 1, 1], [], []>} : vector<2x32xbf16>, vector<32x768xbf16>, vector<2x768xf32> -> vector<2x768xf32>
    %254 = arith.truncf %250 : vector<2x8xf32> to vector<2x8xbf16>
    %c0_84 = arith.constant 0 : index
    %c0_85 = arith.constant 0 : index
    %255 = vector.load %arg6[%c0_84, %c0_85] : memref<8x768xbf16, #tpu.memory_space<vmem>>, vector<8x768xbf16>
    %cst_86 = arith.constant dense<0.000000e+00> : vector<2x768xf32>
    %256 = tpu.matmul %254, %255, %cst_86 {dimension_numbers = #tpu.dot_dimension_numbers<[1], [0], [0], [1], [0, 0, 1, 1], [], []>} : vector<2x8xbf16>, vector<8x768xbf16>, vector<2x768xf32> -> vector<2x768xf32>
    %257 = arith.addf %253, %256 : vector<2x768xf32>
    %c0_87 = arith.constant 0 : index
    %c1536 = arith.constant 1536 : index
    %258 = vector.load %arg3[%c0_87, %c1536] : memref<1x3200xf32, #tpu.memory_space<vmem>>, vector<1x768xf32>
    %259 = vector.broadcast %258 : vector<1x768xf32> to vector<2x768xf32>
    %260 = arith.addf %257, %259 : vector<2x768xf32>
    %cst_88 = arith.constant 0.000000e+00 : f32
    %261 = vector.broadcast %cst_88 : f32 to vector<2x768xf32>
    %262 = arith.maximumf %260, %261 : vector<2x768xf32>
    %263 = arith.truncf %262 : vector<2x768xf32> to vector<2x768xbf16>
    %c0_89 = arith.constant 0 : index
    %c0_90 = arith.constant 0 : index
    %264 = vector.load %arg7[%c0_89, %c0_90] : memref<768x384xbf16, #tpu.memory_space<vmem>>, vector<768x384xbf16>
    %cst_91 = arith.constant dense<0.000000e+00> : vector<2x384xf32>
    %265 = tpu.matmul %263, %264, %cst_91 {dimension_numbers = #tpu.dot_dimension_numbers<[1], [0], [0], [1], [0, 0, 1, 1], [], []>} : vector<2x768xbf16>, vector<768x384xbf16>, vector<2x384xf32> -> vector<2x384xf32>
    %c0_92 = arith.constant 0 : index
    %c2304 = arith.constant 2304 : index
    %266 = vector.load %arg3[%c0_92, %c2304] : memref<1x3200xf32, #tpu.memory_space<vmem>>, vector<1x384xf32>
    %267 = vector.broadcast %266 : vector<1x384xf32> to vector<2x384xf32>
    %268 = arith.addf %265, %267 : vector<2x384xf32>
    %cst_93 = arith.constant 0.000000e+00 : f32
    %269 = vector.broadcast %cst_93 : f32 to vector<2x384xf32>
    %270 = arith.maximumf %268, %269 : vector<2x384xf32>
    %271 = arith.truncf %270 : vector<2x384xf32> to vector<2x384xbf16>
    %c304 = arith.constant 304 : index
    %c0_94 = arith.constant 0 : index
    %272 = vector.load %arg4[%c304, %c0_94] : memref<816x128xbf16, #tpu.memory_space<vmem>>, vector<384x128xbf16>
    %cst_95 = arith.constant dense<0.000000e+00> : vector<2x128xf32>
    %273 = tpu.matmul %271, %272, %cst_95 {dimension_numbers = #tpu.dot_dimension_numbers<[1], [0], [0], [1], [0, 0, 1, 1], [], []>} : vector<2x384xbf16>, vector<384x128xbf16>, vector<2x128xf32> -> vector<2x128xf32>
    %c0_96 = arith.constant 0 : index
    %c2688 = arith.constant 2688 : index
    %274 = vector.load %arg3[%c0_96, %c2688] : memref<1x3200xf32, #tpu.memory_space<vmem>>, vector<1x128xf32>
    %275 = vector.broadcast %274 : vector<1x128xf32> to vector<2x128xf32>
    %276 = arith.addf %273, %275 : vector<2x128xf32>
    %cst_97 = arith.constant 0.000000e+00 : f32
    %277 = vector.broadcast %cst_97 : f32 to vector<2x128xf32>
    %278 = arith.maximumf %276, %277 : vector<2x128xf32>
    %279 = arith.truncf %278 : vector<2x128xf32> to vector<2x128xbf16>
    %c688 = arith.constant 688 : index
    %c0_98 = arith.constant 0 : index
    %280 = vector.load %arg4[%c688, %c0_98] : memref<816x128xbf16, #tpu.memory_space<vmem>>, vector<128x32xbf16>
    %cst_99 = arith.constant dense<0.000000e+00> : vector<2x32xf32>
    %281 = tpu.matmul %279, %280, %cst_99 {dimension_numbers = #tpu.dot_dimension_numbers<[1], [0], [0], [1], [0, 0, 1, 1], [], []>} : vector<2x128xbf16>, vector<128x32xbf16>, vector<2x32xf32> -> vector<2x32xf32>
    %c0_100 = arith.constant 0 : index
    %c2816 = arith.constant 2816 : index
    %282 = vector.load %arg3[%c0_100, %c2816] : memref<1x3200xf32, #tpu.memory_space<vmem>>, vector<1x32xf32>
    %283 = vector.broadcast %282 : vector<1x32xf32> to vector<2x32xf32>
    %284 = arith.addf %281, %283 : vector<2x32xf32>
    %cst_101 = arith.constant 0.000000e+00 : f32
    %285 = vector.broadcast %cst_101 : f32 to vector<2x32xf32>
    %286 = arith.maximumf %284, %285 : vector<2x32xf32>
    %c0_102 = arith.constant 0 : index
    %c3072 = arith.constant 3072 : index
    %287 = vector.load %arg3[%c0_102, %c3072] : memref<1x3200xf32, #tpu.memory_space<vmem>>, vector<1x32xf32>
    %288 = vector.broadcast %287 : vector<1x32xf32> to vector<2x32xf32>
    %289 = arith.mulf %286, %288 : vector<2x32xf32>
    %cst_103 = arith.constant dense<0.000000e+00> : vector<2xf32>
    %290 = vector.multi_reduction <add>, %289, %cst_103 [1] : vector<2x32xf32> to vector<2xf32>
    %291 = vector.shape_cast %290 : vector<2xf32> to vector<2x1xf32>
    %c0_104 = arith.constant 0 : index
    %c2944 = arith.constant 2944 : index
    %292 = vector.load %arg3[%c0_104, %c2944] : memref<1x3200xf32, #tpu.memory_space<vmem>>, vector<1x1xf32>
    %293 = vector.broadcast %292 : vector<1x1xf32> to vector<2x1xf32>
    %294 = arith.addf %291, %293 : vector<2x1xf32>
    %295 = arith.negf %294 : vector<2x1xf32>
    %296 = math.exp %295 : vector<2x1xf32>
    %cst_105 = arith.constant 1.000000e+00 : f32
    %297 = vector.broadcast %cst_105 : f32 to vector<2x1xf32>
    %298 = arith.addf %297, %296 : vector<2x1xf32>
    %299 = arith.divf %297, %298 : vector<2x1xf32>
    %300 = vector.shape_cast %299 : vector<2x1xf32> to vector<1x2xf32>
    %c0_106 = arith.constant 0 : index
    %c0_107 = arith.constant 0 : index
    %301 = vector.load %arg8[%c0_106, %c0_107] : memref<1x2xf32, #tpu.memory_space<vmem>>, vector<1x2xf32>
    tpu.vector_store %arg8[%c0_106, %c0_107], %300 {strides = array<i32>} : memref<1x2xf32, #tpu.memory_space<vmem>>, vector<1x2xf32>,
    return
  }
}

</mosaic_0001>

<bundles_post_ra>
// kernel: enhanced_bert_classifier.1
= control target key start
LH: loop header
LB: loop body
LE: loop exit
PB: predicated region body
PF: predicated region fallthrough
CT: control target
= control target key end

     0   :  { %13 = vsyncpa [#allocation3], 0  ;;  %s4423_s0 = inlined_call_operand.vmem [shape: s32[16,1], index: 0, kind: input, shape index: {}]   ;;  %s4424_s1 = inlined_call_operand.vmem [shape: f32[2,8], index: 1, kind: input, shape index: {}]   ;;  %s4425_s2 = inlined_call_operand.vmem [shape: f32[2,8], index: 2, kind: input, shape index: {}]   ;;  %s4426_s3 = inlined_call_operand.hbm [shape: f32[1,3200], index: 3, kind: input, shape index: {}]   ;;  %s4427_s4 = inlined_call_operand.hbm [shape: bf16[816,128], index: 4, kind: input, shape index: {}]   ;;  %s4428_s5 = inlined_call_operand.hbm [shape: bf16[32,768], index: 5, kind: input, shape index: {}]   ;;  %s4429_s6 = inlined_call_operand.hbm [shape: bf16[8,768], index: 6, kind: input, shape index: {}]   ;;  %s4430_s7 = inlined_call_operand.hbm [shape: bf16[768,384], index: 7, kind: input, shape index: {}]   ;;  %s4431_s8 = inlined_call_operand.hbm [shape: f32[1,2], index: 8, kind: output, shape index: {}]  }
   0x1   :  { %14 = vsyncpa [#allocation6], 0 }
   0x2   :  { %15 = vsyncpa [#allocation9], 0  ;;  %s38_s29 = sshll.u32 %s4427_s4, 4  ;;  %s39_s29 = int_to_ptr.hbm [resolvable:$true] %s38_s29 }
   0x3   :  { %16 = vsyncpa [#allocation4], 0  ;;  %s4126_s30 = smov [#allocation5]   ;;  %s65_s12 = sshll.u32 %s4429_s6, 4  ;;  %s66_s12 = int_to_ptr.hbm [resolvable:$true] %s65_s12 }
   0x4   :  { %s40_s9 = sshll.u32 %s4126_s30, 4  ;;  %s4127_s13 = smov 64   ;;  %s41_s9 = int_to_ptr.vmem [resolvable:$true] %s40_s9 }
   0x5   :  { %s4128_s14 = smov 4   ;;  %s4129_s15 = smov [#allocation8]  }
   0x6   :  { %46 = dma.hbm_to_vmem [thread:$0]  %s39_s29, 6528, %s41_s9, [#allocation6], %s4127_s13, %s4127_s13, %s4128_s14  }
   0x7   :  { %s67_s16 = sshll.u32 %s4129_s15, 4  ;;  %s28_s4 = sshll.u32 %s4426_s3, 4  ;;  %s68_s16 = int_to_ptr.vmem [resolvable:$true] %s67_s16  ;;  %s29_s4 = int_to_ptr.hbm [resolvable:$true] %s28_s4 }
   0x8   :  { %70 = dma.hbm_to_vmem [thread:$0]  %s66_s12, 384, %s68_s16, [#allocation9]  }
   0x9   :  { %s51_s21 = sshll.u32 %s4428_s5, 4  ;;  %s4130_s6 = smov [#allocation2]   ;;  %s52_s21 = int_to_ptr.hbm [resolvable:$true] %s51_s21 }
   0xa   :  { %s30_s22 = sshll.u32 %s4130_s6, 4  ;;  %s4131_s23 = smov [#allocation7]   ;;  %s31_s22 = int_to_ptr.vmem [resolvable:$true] %s30_s22 }
   0xb   :  { %33 = dma.hbm_to_vmem [thread:$0]  %s29_s4, 400, %s31_s22, [#allocation3]  }
   0xc   :  { %s53_s24 = sshll.u32 %s4131_s23, 4  ;;  %s4132_s25 = smov 384   ;;  %s54_s24 = int_to_ptr.vmem [resolvable:$true] %s53_s24 }
   0xd   :  { %s4133_s26 = smov 24   ;;  %s75_s28 = sshll.u32 %s4430_s7, 4  ;;  %s76_s28 = int_to_ptr.hbm [resolvable:$true] %s75_s28 }
   0xe   :  { %59 = dma.hbm_to_vmem [thread:$0]  %s52_s21, 1536, %s54_s24, [#allocation6], %s4132_s25, %s4132_s25, %s4133_s26  }
   0xf   :  { %s4134_s29 = smov [#allocation10]   ;;  %s4135_s5 = smov 192  }
  0x10   :  { %s77_s30 = sshll.u32 %s4134_s29, 4  ;;  %s4136_s9 = smov 12   ;;  %s78_s30 = int_to_ptr.vmem [resolvable:$true] %s77_s30 }
  0x11   :  { %83 = dma.hbm_to_vmem [thread:$0]  %s76_s28, 18432, %s78_s30, [#allocation9], %s4135_s5, %s4135_s5, %s4136_s9  }
  0x12   :  { %4118 = dma.done.wait [#allocation3], 400  }
  0x13   :  { %4119 = vsyncadd [#allocation3], 4294966896 }
  0x14   :  { %4120 = dma.done.wait [#allocation6], 8064  }
  0x15   :  { %4121 = vsyncadd [#allocation6], 4294959232 }
  0x16   :  { %4122 = dma.done.wait [#allocation9], 18816  }
  0x17   :  { %4123 = vsyncadd [#allocation9], 4294948480  ;;  %v4137_v0 = vmov 0   ;;  %v105_v1 = vld [vmem:[%s4423_s0] sm:$0xff]  ;;  %v3681_v2 = vld [vmem:[#allocation5 + $0x18] sm:$0xff]  ;;  %v107_v7 = vlaneseq  ;;  %v4138_v11 = vmov 0.0  }
  0x18   :  { %3904 = vset.pattern.permute.xlu0 %v4137_v0  ;;  %3915 = vset.pattern.permute.xlu2 %v4137_v0  ;;  %v106_v3 = vld [vmem:[%s4423_s0 + $0x8] sm:$0xff]  ;;  %v3678_v6 = vld [vmem:[#allocation5] sm:$0xff]  ;;  %vm156_vm2 = vcmask 523264   ;;  %vm176_vm3 = vcmask 261120   ;;  %v4139_v23 = vmov 32.0   ;;  %s4140_s0 = smov 96  }
  0x19   :  { %110 = vperm.xlu0 %3904, %v105_v1   ;;  %164 = vmatpush.bf16.msra.mxu0 %v3681_v2  ;;  %v3680_v4 = vld [vmem:[#allocation5 + $0x10] sm:$0xff]  ;;  %v3679_v5 = vld [vmem:[#allocation5 + $0x8] sm:$0xff]  ;;  %v4214_v9 = vand.u32 127, %v107_v7  ;;  %v130_v15 = vld [vmem:[#allocation5 + $0x20] sm:$0xf]  ;;  %3932 = vrcp.f32 %v4139_v23  ;;  %s4141_s14 = smov 80  }
  0x1a   :  { %v131_v16 = vunpack.c.l.bf16 %v130_v15  ;;  %v3683_v40 = vld [vmem:[#allocation5 + $0x30] sm:$0xff]  ;;  %v3682_v42 = vld [vmem:[#allocation5 + $0x28] sm:$0xff]  ;;  %v3916_v61 = vld [vmem:[#allocation2] ss:$0 sm:$0xff]  ;;  %s4142_s15 = smov 112   ;;  %vm282_vm11 = vcmask 130048  }
  0x1b   :  { %268 = vmatpush.bf16.msra.mxu1 %v3683_v40  ;;  %v3917_v2 = vld [vmem:[#allocation2 + $0x1] ss:$0 sm:$0xff]  ;;  %v3918_v7 = vld [vmem:[#allocation2 + $0x2] ss:$0 sm:$0xff]  ;;  %vm310_vm12 = vcmask 64512   ;;  %s2810_s6 = sshll.u32 %s4431_s8, 4  ;;  %s2811_s6 = int_to_ptr.hbm [resolvable:$true] %s2810_s6 }
  0x1d   :  { %165 = vmatpush.bf16.msra.mxu0 %v3680_v4 }
  0x1f   :  { %v3933_v24 = vpop.eup %3932  ;;  %269 = vmatpush.bf16.msra.mxu1 %v3682_v42 }
  0x20   :  { %v184_v25 = vmul.f32 32.0, %v3933_v24  ;;  %vm188_vm4 = vweird.f32 %v3933_v24 }
  0x21   :  { %113 = vperm.xlu0 %3904, %v106_v3   ;;  %166 = vmatpush.bf16.msra.mxu0 %v3679_v5 }
  0x22   :  { %v185_v26 = vsub.f32 1.0, %v184_v25 }
  0x24   :  { %v186_v27 = vmul.f32 %v3933_v24, %v185_v26 }
  0x25   :  { %167 = vmatpush.bf16.msra.mxu0 %v3678_v6 }
  0x26   :  { %v187_v28 = vadd.f32 %v3933_v24, %v186_v27 }
  0x28   :  { %v4220_v29 = vsel %vm188_vm4, %v3933_v24, %v187_v28 }
  0x8b   :  { %v111_v8 = vpop.permute.xlu0 %110 }
  0x8c   :  { %vm115_vm0 = vcmp.eq.s32.totalorder %v111_v8, %v4214_v9 }
  0x8d   :  { %v2822_v12 = vsel %vm115_vm0, 1.0, %v4138_v11 }
  0x93   :  { %v114_v10 = vpop.permute.xlu0 %113 }
  0x94   :  { %vm116_vm1 = vcmp.eq.s32.totalorder %v114_v10, %v4214_v9 }
  0x95   :  { %v2823_v13 = vsel %vm116_vm1, 1.0, %v4138_v11 }
  0x96   :  { %v121_v14 = vpack.c.bf16 %v2823_v13, %v2822_v12 }
  0x98   :  { %2840 = vmatmul.msk.bf16.vlgmr.msra.gmra.mxu0 %vm156_vm2, %v121_v14 }
 0x115   :  { %v169_v17 = vpop.f32.mrf.mxu0 }
 0x116   :  { %v170_v18 = vadd.f32 %v169_v17, %v131_v16  ;;  %v276_v17 = vld [vmem:[%s4424_s1] sm:$0x3]  ;;  %s4143_s1 = smov 48  }
 0x118   :  { %v177_v19 = vsel %vm176_vm3, %v170_v18, 0.0 }
 0x119   :  { %178 = vadd.xlane.f32.xlu1 %v177_v19 }
 0x11d   :  { %v171_v20 = vpop.f32.mrf.mxu0 }
 0x11e   :  { %v172_v21 = vadd.f32 %v171_v20, %v131_v16 }
 0x120   :  { %v180_v22 = vsel %vm176_vm3, %v172_v21, 0.0 }
 0x121   :  { %181 = vadd.xlane.f32.xlu1 %v180_v22 }
 0x18c   :  { %v179_v30 = vpop.xlane.xlu1 %178 }
 0x18d   :  { %v190_v31 = vmul.f32 %v4220_v29, %v179_v30 }
 0x18f   :  { %v192_v32 = vsub.f32 %v170_v18, %v190_v31  ;;  %v2850_v18 = vadd.f32 -1.0, %v276_v17 }
 0x191   :  { %v194_v33 = vmul.f32 %v192_v32, %v192_v32  ;;  %v278_v19 = vmul.f32 1e+09, %v2850_v18 }
 0x193   :  { %v196_v34 = vsel %vm176_vm3, %v194_v33, 0.0  ;;  %v308_v20 = vperm.slane %v278_v19, 0  ;;  %v448_v27 = vperm.slane %v278_v19, 1  ;;  %v3685_v19 = vld [vmem:[#allocation5 + $0x40] sm:$0xff] }
 0x194   :  { %197 = vadd.xlane.f32.xlu2 %v196_v34  ;;  %v182_v35 = vpop.xlane.xlu1 %181 }
 0x195   :  { %v191_v36 = vmul.f32 %v4220_v29, %v182_v35 }
 0x197   :  { %v193_v37 = vsub.f32 %v172_v21, %v191_v36 }
 0x199   :  { %v195_v38 = vmul.f32 %v193_v37, %v193_v37 }
 0x19b   :  { %v199_v39 = vsel %vm176_vm3, %v195_v38, 0.0 }
 0x19c   :  { %200 = vadd.xlane.f32.xlu2 %v199_v39 }
 0x207   :  { %v198_v41 = vpop.xlane.xlu2 %197 }
 0x208   :  { %v202_v43 = vmul.f32 %v198_v41, %v4220_v29 }
 0x20a   :  { %v204_v44 = vadd.f32 1e-12, %v202_v43 }
 0x20c   :  { %3934 = vrsqrt.f32 %v204_v44  ;;  %vm212_vm6 = vweird.f32 %v204_v44 }
 0x20f   :  { %v201_v45 = vpop.xlane.xlu2 %200 }
 0x210   :  { %v203_v46 = vmul.f32 %v201_v45, %v4220_v29 }
 0x212   :  { %v3935_v47 = vpop.eup %3934  ;;  %v205_v48 = vadd.f32 1e-12, %v203_v46 }
 0x213   :  { %v207_v49 = vmul.f32 %v3935_v47, %v204_v44  ;;  %vm213_vm5 = vweird.f32 %v3935_v47 }
 0x214   :  { %3936 = vrsqrt.f32 %v205_v48  ;;  %vm214_vm7 = vmor %vm212_vm6, %vm213_vm5  ;;  %vm222_vm9 = vweird.f32 %v205_v48 }
 0x215   :  { %v208_v50 = vmul.f32 %v3935_v47, %v207_v49 }
 0x217   :  { %v209_v51 = vmul.f32 0.5, %v208_v50 }
 0x219   :  { %v210_v52 = vsub.f32 1.5, %v209_v51 }
 0x21a   :  { %v3937_v53 = vpop.eup %3936 }
 0x21b   :  { %v211_v54 = vmul.f32 %v3935_v47, %v210_v52  ;;  %v217_v55 = vmul.f32 %v3937_v53, %v205_v48  ;;  %vm223_vm8 = vweird.f32 %v3937_v53 }
 0x21c   :  { %vm224_vm10 = vmor %vm222_vm9, %vm223_vm8 }
 0x21d   :  { %v218_v56 = vmul.f32 %v3937_v53, %v217_v55  ;;  %v215_v57 = vsel %vm214_vm7, %v3935_v47, %v211_v54 }
 0x21e   :  { %v226_v60 = vmul.f32 %v215_v57, %v192_v32 }
 0x21f   :  { %v219_v58 = vmul.f32 0.5, %v218_v56 }
 0x220   :  { %v231_v1 = vmul.f32 %v3916_v61, %v226_v60 }
 0x221   :  { %v220_v59 = vsub.f32 1.5, %v219_v58 }
 0x222   :  { %v4228_v4 = vadd.f32 %v3917_v2, %v231_v1 }
 0x223   :  { %v221_v62 = vmul.f32 %v3937_v53, %v220_v59 }
 0x225   :  { %v225_v63 = vsel %vm224_vm10, %v3937_v53, %v221_v62 }
 0x226   :  { %v227_v0 = vmul.f32 %v225_v63, %v193_v37 }
 0x228   :  { %v232_v3 = vmul.f32 %v3916_v61, %v227_v0 }
 0x22a   :  { %v4230_v5 = vadd.f32 %v3917_v2, %v232_v3 }
 0x22c   :  { %v238_v6 = vpack.c.bf16 %v4230_v5, %v4228_v4 }
 0x22e   :  { %2849 = vmatmul.msk.bf16.vlgmr.msra.gmra.mxu1 %vm176_vm3, %v238_v6 }
 0x2ab   :  { %v271_v8 = vpop.f32.mrf.mxu1 }
 0x2ac   :  { %v4235_v10 = vadd.f32 %v3918_v7, %v271_v8 }
 0x2ae   :  { %280 = vrot.lane.b32.xlu0 %v4235_v10, %s4140_s0 }
 0x2b3   :  { %v273_v11 = vpop.f32.mrf.mxu1 }
 0x2b4   :  { %v4240_v12 = vadd.f32 %v3918_v7, %v273_v11 }
 0x2b6   :  { %322 = vrot.lane.b32.xlu0 %v4235_v10, %s4127_s13  ;;  %v3905_v2 = vpack.i.bf16 %v4240_v12, %v4235_v10 }
 0x2be   :  { %489 = vrot.lane.b32.xlu0 %v4240_v12, %s4141_s14 }
 0x2c6   :  { %487 = vrot.lane.b32.xlu0 %v4240_v12, %s4142_s15 }
 0x2ce   :  { %421 = vrot.lane.b32.xlu0 %v4240_v12, %s4140_s0 }
 0x320   :  { %v281_v13 = vpop.permute.xlu0 %280 }
 0x321   :  { %2851 = vmatpush.xpose.msk.msra.mxu2 %vm282_vm11, %v281_v13 }
 0x324   :  { %2852 = vmatmul.msk.f32.vlgmr.msra.gmra.mxu2 %vm282_vm11, %v4235_v10 }
 0x328   :  { %v323_v14 = vpop.permute.xlu0 %322 }
 0x329   :  { %343 = vmatpush.msra.mxu3 %v323_v14 }
 0x330   :  { %v490_v15 = vpop.permute.xlu0 %489 }
 0x331   :  { %2860 = vmatpush.xpose.msk.msrb.mxu1 %vm282_vm11, %v490_v15 }
 0x335   :  { %589 = vmatpush.bf16.msra.mxu1 %v3685_v19  ;;  %v3922_v19 = vld [vmem:[#allocation2 + $0x6] ss:$0 sm:$0xff] }
 0x338   :  { %v488_v16 = vpop.permute.xlu0 %487 }
 0x339   :  { %2861 = vmatmul.msk.f32.vlgmr.msrb.gmra.mxu1 %vm282_vm11, %v488_v16 }
 0x340   :  { %v422_v45 = vpop.permute.xlu0 %421 }
 0x3a7   :  { %v304_v21 = vpop.f32.mrf.mxu2 }
 0x3a8   :  { %v307_v22 = vmul.f32 0.25, %v304_v21 }
 0x3aa   :  { %v309_v23 = vadd.f32 %v308_v20, %v307_v22 }
 0x3ac   :  { %v311_v24 = vsel %vm310_vm12, %v309_v23, -inf }
 0x3ad   :  { %312 = vmax.xlane.f32.xlu1 %v311_v24 }
 0x3b6   :  { %v512_v25 = vpop.f32.mrf.mxu1 }
 0x3b7   :  { %v515_v26 = vmul.f32 0.25, %v512_v25 }
 0x3b9   :  { %v516_v28 = vadd.f32 %v515_v26, %v448_v27 }
 0x3bb   :  { %v517_v30 = vsel %vm310_vm12, %v516_v28, -inf }
 0x3c6   :  { %350 = vrot.lane.b32.xlu1 %v4235_v10, %s4141_s14 }
 0x3f0   :  { %518 = vmax.xlane.f32.xlu1 %v517_v30 }
 0x420   :  { %v313_v31 = vpop.xlane.xlu1 %312 }
 0x421   :  { %v314_v32 = vsub.f32 %v309_v23, %v313_v31  ;;  %v3684_v23 = vld [vmem:[#allocation5 + $0x38] sm:$0xff] }
 0x422   :  { %590 = vmatpush.bf16.msra.mxu1 %v3684_v23  ;;  %v3695_v23 = vld [vmem:[#allocation5 + $0x90] sm:$0xff] }
 0x423   :  { %v315_v33 = vmul.f32 1.442695, %v314_v32  ;;  %v3919_v32 = vld [vmem:[#allocation2 + $0x3] ss:$0 sm:$0xff] }
 0x425   :  { %3938 = vpow2.f32 %v315_v33 }
 0x426   :  { %842 = vmatpush.bf16.msrb.mxu1 %v3695_v23 }
 0x42b   :  { %v3939_v34 = vpop.eup %3938 }
 0x42c   :  { %v317_v35 = vsel %vm310_vm12, %v3939_v34, 0.0 }
 0x42d   :  { %318 = vadd.xlane.f32.xlu2 %v317_v35 }
 0x438   :  { %v351_v36 = vpop.permute.xlu1 %350 }
 0x439   :  { %2854 = vmatpush.xpose.msk.msrb.mxu3 %vm282_vm11, %v351_v36 }
 0x445   :  { %348 = vrot.lane.b32.xlu2 %v4235_v10, %s4142_s15 }
 0x463   :  { %v519_v37 = vpop.xlane.xlu1 %518 }
 0x464   :  { %v520_v38 = vsub.f32 %v516_v28, %v519_v37 }
 0x466   :  { %v521_v39 = vmul.f32 1.442695, %v520_v38 }
 0x468   :  { %3940 = vpow2.f32 %v521_v39 }
 0x46e   :  { %v3941_v40 = vpop.eup %3940 }
 0x46f   :  { %v523_v41 = vsel %vm310_vm12, %v3941_v40, 0.0 }
 0x470   :  { %524 = vadd.xlane.f32.xlu1 %v523_v41 }
 0x489   :  { %461 = vrot.lane.b32.xlu1 %v4240_v12, %s4127_s13  ;;  %s4144_s13 = smov 16  }
 0x4a0   :  { %v319_v42 = vpop.xlane.xlu2 %318 }
 0x4a1   :  { %3942 = vrcp.f32 %v319_v42 }
 0x4a7   :  { %v3943_v43 = vpop.eup %3942 }
 0x4a8   :  { %v321_v44 = vmul.f32 %v3943_v43, %v3939_v34  ;;  %v349_v46 = vpop.permute.xlu2 %348 }
 0x4aa   :  { %2853 = vmatmul.msk.f32.vlgmr.msra.gmra.mxu3 %vm310_vm12, %v321_v44 }
 0x4ab   :  { %2857 = vmatpush.xpose.msk.msra.mxu3 %vm282_vm11, %v422_v45 }
 0x4b2   :  { %2855 = vmatmul.msk.f32.vlgmr.msrb.gmra.mxu3 %vm282_vm11, %v349_v46 }
 0x4ba   :  { %2858 = vmatmul.msk.f32.vlgmr.msra.gmra.mxu3 %vm282_vm11, %v4240_v12 }
 0x4e3   :  { %v525_v3 = vpop.xlane.xlu1 %524 }
 0x4fb   :  { %v462_v18 = vpop.permute.xlu1 %461 }
 0x52d   :  { %v4269_v47 = vpop.f32.mrf.mxu3 }
 0x535   :  { %v373_v48 = vpop.f32.mrf.mxu3 }
 0x536   :  { %v376_v49 = vmul.f32 0.25, %v373_v48 }
 0x538   :  { %v377_v50 = vadd.f32 %v376_v49, %v308_v20 }
 0x53a   :  { %v378_v51 = vsel %vm310_vm12, %v377_v50, -inf }
 0x53b   :  { %379 = vmax.xlane.f32.xlu2 %v378_v51 }
 0x53d   :  { %v444_v52 = vpop.f32.mrf.mxu3 }
 0x53e   :  { %v447_v53 = vmul.f32 0.25, %v444_v52 }
 0x540   :  { %v449_v54 = vadd.f32 %v448_v27, %v447_v53  ;;  %v3686_v53 = vld [vmem:[#allocation5 + $0x48] sm:$0xff] }
 0x542   :  { %v450_v55 = vsel %vm310_vm12, %v449_v54, -inf }
 0x543   :  { %451 = vmax.xlane.f32.xlu0 %v450_v55 }
 0x5ae   :  { %v380_v56 = vpop.xlane.xlu2 %379 }
 0x5af   :  { %v381_v57 = vsub.f32 %v377_v50, %v380_v56 }
 0x5b1   :  { %v382_v58 = vmul.f32 1.442695, %v381_v57 }
 0x5b3   :  { %3944 = vpow2.f32 %v382_v58 }
 0x5b6   :  { %v452_v59 = vpop.xlane.xlu0 %451 }
 0x5b7   :  { %v453_v60 = vsub.f32 %v449_v54, %v452_v59 }
 0x5b9   :  { %v3945_v61 = vpop.eup %3944  ;;  %v454_v62 = vmul.f32 1.442695, %v453_v60 }
 0x5ba   :  { %v384_v63 = vsel %vm310_vm12, %v3945_v61, 0.0 }
 0x5bb   :  { %3946 = vpow2.f32 %v454_v62  ;;  %385 = vadd.xlane.f32.xlu2 %v384_v63 }
 0x5bc   :  { %3948 = vrcp.f32 %v525_v3 }
 0x5c1   :  { %v3947_v0 = vpop.eup %3946 }
 0x5c2   :  { %v456_v1 = vsel %vm310_vm12, %v3947_v0, 0.0  ;;  %v3949_v7 = vpop.eup %3948 }
 0x5c3   :  { %457 = vadd.xlane.f32.xlu0 %v456_v1  ;;  %v527_v16 = vmul.f32 %v3949_v7, %v3941_v40  ;;  %v3920_v7 = vld [vmem:[#allocation2 + $0x4] ss:$0 sm:$0xff] }
 0x5d3   :  { %3906 = vrot.lane.b32.xlu2 %v3905_v2, %s4143_s1 }
 0x62e   :  { %v386_v6 = vpop.xlane.xlu2 %385 }
 0x62f   :  { %3950 = vrcp.f32 %v386_v6 }
 0x635   :  { %v3951_v8 = vpop.eup %3950 }
 0x636   :  { %v3907_v11 = vpop.permute.xlu2 %3906  ;;  %v458_v13 = vpop.xlane.xlu0 %457  ;;  %v388_v17 = vmul.f32 %v3951_v8, %v3945_v61 }
 0x637   :  { %v3909_v14 = vunpack.i.h.bf16 %v3907_v11  ;;  %3952 = vrcp.f32 %v458_v13  ;;  %v3908_v15 = vunpack.i.l.bf16 %v3907_v11 }
 0x639   :  { %410 = vmatpush.msrb.mxu2 %v3908_v15  ;;  %549 = vmatpush.msrb.mxu3 %v3909_v14  ;;  %v3921_v14 = vld [vmem:[#allocation2 + $0x5] ss:$0 sm:$0xff] }
 0x63a   :  { %2856 = vmatmul.msk.f32.vlgmr.msrb.gmra.mxu2 %vm310_vm12, %v388_v17  ;;  %2862 = vmatmul.msk.f32.vlgmr.msrb.gmra.mxu3 %vm310_vm12, %v527_v16 }
 0x63b   :  { %482 = vmatpush.msra.mxu2 %v462_v18 }
 0x63d   :  { %v3953_v10 = vpop.eup %3952 }
 0x63e   :  { %v460_v12 = vmul.f32 %v3953_v10, %v3947_v0 }
 0x642   :  { %2859 = vmatmul.msk.f32.vlgmr.msra.gmra.mxu2 %vm310_vm12, %v460_v12 }
 0x6bd   :  { %v412_v20 = vpop.f32.mrf.mxu2  ;;  %v551_v21 = vpop.f32.mrf.mxu3 }
 0x6be   :  { %v3910_v22 = vpack.i.bf16 %v551_v21, %v412_v20 }
 0x6c0   :  { %3911 = vrot.lane.b32.xlu0 %v3910_v22, %s4144_s13 }
 0x6c5   :  { %v484_v27 = vpop.f32.mrf.mxu2 }
 0x732   :  { %v3912_v24 = vpop.permute.xlu0 %3911 }
 0x733   :  { %v3914_v25 = vunpack.i.h.bf16 %v3912_v24  ;;  %v3913_v26 = vunpack.i.l.bf16 %v3912_v24 }
 0x735   :  { %v558_v28 = vsel %vm282_vm11, %v484_v27, %v3914_v25  ;;  %v419_v30 = vsel %vm282_vm11, %v4269_v47, %v3913_v26  ;;  %v3694_v27 = vld [vmem:[#allocation5 + $0x88] sm:$0xff] }
 0x736   :  { %v559_v31 = vpack.c.bf16 %v558_v28, %v419_v30  ;;  %843 = vmatpush.bf16.msrb.mxu1 %v3694_v27 }
 0x738   :  { %2871 = vmatmul.msk.bf16.vlgmr.msra.gmra.mxu1 %vm176_vm3, %v559_v31 }
 0x7b5   :  { %v592_v33 = vpop.f32.mrf.mxu1 }
 0x7b6   :  { %v593_v34 = vadd.f32 %v3919_v32, %v592_v33 }
 0x7b8   :  { %v597_v35 = vadd.f32 %v593_v34, %v4228_v4 }
 0x7ba   :  { %v601_v36 = vsel %vm176_vm3, %v597_v35, 0.0 }
 0x7bb   :  { %602 = vadd.xlane.f32.xlu2 %v601_v36 }
 0x7bd   :  { %v594_v37 = vpop.f32.mrf.mxu1 }
 0x7be   :  { %v595_v38 = vadd.f32 %v3919_v32, %v594_v37  ;;  %v3693_v32 = vld [vmem:[#allocation5 + $0x80] sm:$0xff] }
 0x7bf   :  { %844 = vmatpush.bf16.msrb.mxu1 %v3693_v32 }
 0x7c0   :  { %v598_v39 = vadd.f32 %v595_v38, %v4230_v5  ;;  %v3687_v5 = vld [vmem:[#allocation5 + $0x50] sm:$0xff] }
 0x7c1   :  { %685 = vmatpush.bf16.msra.mxu3 %v3687_v5 }
 0x7c2   :  { %v604_v40 = vsel %vm176_vm3, %v598_v39, 0.0 }
 0x7c3   :  { %605 = vadd.xlane.f32.xlu1 %v604_v40  ;;  %v3691_v40 = vld [vmem:[#allocation5 + $0x70] sm:$0xff] }
 0x7c5   :  { %686 = vmatpush.bf16.msra.mxu3 %v3686_v53 }
 0x82e   :  { %v603_v41 = vpop.xlane.xlu2 %602 }
 0x82f   :  { %v607_v42 = vmul.f32 %v603_v41, %v4220_v29 }
 0x831   :  { %v609_v43 = vsub.f32 %v597_v35, %v607_v42  ;;  %v3692_v35 = vld [vmem:[#allocation5 + $0x78] sm:$0xff] }
 0x832   :  { %845 = vmatpush.bf16.msrb.mxu1 %v3692_v35 }
 0x833   :  { %v611_v44 = vmul.f32 %v609_v43, %v609_v43 }
 0x835   :  { %v613_v45 = vsel %vm176_vm3, %v611_v44, 0.0 }
 0x836   :  { %v606_v46 = vpop.xlane.xlu1 %605  ;;  %614 = vadd.xlane.f32.xlu0 %v613_v45  ;;  %846 = vmatpush.bf16.msrb.mxu1 %v3691_v40  ;;  %v3690_v45 = vld [vmem:[#allocation5 + $0x68] sm:$0xff] }
 0x837   :  { %v608_v4 = vmul.f32 %v606_v46, %v4220_v29 }
 0x839   :  { %v610_v47 = vsub.f32 %v598_v39, %v608_v4 }
 0x83a   :  { %847 = vmatpush.bf16.msrb.mxu1 %v3690_v45 }
 0x83b   :  { %v612_v48 = vmul.f32 %v610_v47, %v610_v47 }
 0x83d   :  { %v616_v49 = vsel %vm176_vm3, %v612_v48, 0.0 }
 0x83e   :  { %617 = vadd.xlane.f32.xlu2 %v616_v49 }
 0x8a9   :  { %v615_v50 = vpop.xlane.xlu0 %614 }
 0x8aa   :  { %v619_v51 = vmul.f32 %v615_v50, %v4220_v29 }
 0x8ac   :  { %v621_v52 = vadd.f32 1e-12, %v619_v51  ;;  %v3689_v51 = vld [vmem:[#allocation5 + $0x60] sm:$0xff] }
 0x8ad   :  { %848 = vmatpush.bf16.msrb.mxu1 %v3689_v51 }
 0x8ae   :  { %3954 = vrsqrt.f32 %v621_v52  ;;  %vm629_vm14 = vweird.f32 %v621_v52 }
 0x8b1   :  { %v618_v54 = vpop.xlane.xlu2 %617 }
 0x8b2   :  { %v620_v55 = vmul.f32 %v618_v54, %v4220_v29 }
 0x8b4   :  { %v3955_v56 = vpop.eup %3954  ;;  %v622_v57 = vadd.f32 1e-12, %v620_v55 }
 0x8b5   :  { %v624_v58 = vmul.f32 %v3955_v56, %v621_v52  ;;  %vm630_vm13 = vweird.f32 %v3955_v56 }
 0x8b6   :  { %3956 = vrsqrt.f32 %v622_v57  ;;  %vm631_vm15 = vmor %vm629_vm14, %vm630_vm13  ;;  %vm639_vm1 = vweird.f32 %v622_v57 }
 0x8b7   :  { %v625_v59 = vmul.f32 %v3955_v56, %v624_v58 }
 0x8b9   :  { %v626_v60 = vmul.f32 0.5, %v625_v59  ;;  %v3688_v59 = vld [vmem:[#allocation5 + $0x58] sm:$0xff] }
 0x8ba   :  { %849 = vmatpush.bf16.msrb.mxu1 %v3688_v59 }
 0x8bb   :  { %v627_v61 = vsub.f32 1.5, %v626_v60 }
 0x8bc   :  { %v3957_v62 = vpop.eup %3956 }
 0x8bd   :  { %v628_v63 = vmul.f32 %v3955_v56, %v627_v61  ;;  %v634_v0 = vmul.f32 %v3957_v62, %v622_v57  ;;  %vm640_vm0 = vweird.f32 %v3957_v62 }
 0x8be   :  { %vm641_vm2 = vmor %vm639_vm1, %vm640_vm0 }
 0x8bf   :  { %v635_v1 = vmul.f32 %v3957_v62, %v634_v0  ;;  %v632_v2 = vsel %vm631_vm15, %v3955_v56, %v628_v63  ;;  %vm965_vm15 = vcmask 1043456  }
 0x8c0   :  { %v643_v8 = vmul.f32 %v632_v2, %v609_v43 }
 0x8c1   :  { %v636_v3 = vmul.f32 0.5, %v635_v1 }
 0x8c2   :  { %v648_v15 = vmul.f32 %v3920_v7, %v643_v8 }
 0x8c3   :  { %v637_v6 = vsub.f32 1.5, %v636_v3 }
 0x8c4   :  { %v4294_v18 = vadd.f32 %v3921_v14, %v648_v15 }
 0x8c5   :  { %v638_v11 = vmul.f32 %v3957_v62, %v637_v6 }
 0x8c7   :  { %v642_v13 = vsel %vm641_vm2, %v3957_v62, %v638_v11 }
 0x8c8   :  { %v644_v16 = vmul.f32 %v642_v13, %v610_v47 }
 0x8ca   :  { %v649_v17 = vmul.f32 %v3920_v7, %v644_v16 }
 0x8cc   :  { %v4296_v10 = vadd.f32 %v3921_v14, %v649_v17 }
 0x8ce   :  { %v655_v12 = vpack.c.bf16 %v4296_v10, %v4294_v18 }
 0x8d0   :  { %2880 = vmatmul.msk.bf16.vlgmr.msra.gmra.mxu3 %vm176_vm3, %v655_v12 }
 0x953   :  { %v688_v20 = vpop.f32.mrf.mxu3 }
 0x954   :  { %v4301_v21 = vadd.f32 %v3922_v19, %v688_v20 }
 0x956   :  { %v4304_v22 = vmul.f32 0.70710677, %v4301_v21  ;;  %v693_v40 = vmul.f32 0.5, %v4301_v21 }
 0x958   :  { %v697_v24 = vand.u32 2147483647, %v4304_v22  ;;  %vm763_vm13 = vcmp.lt.f32.partialorder %v4304_v22, 0.0 }
 0x95a   :  { %v699_v25 = vmul.f32 0.3275911, %v697_v24  ;;  %v751_v49 = vsub.f32 0.0, %v697_v24 }
 0x95b   :  { %v690_v26 = vpop.f32.mrf.mxu3 }
 0x95c   :  { %v701_v28 = vadd.f32 1.0, %v699_v25  ;;  %v4307_v30 = vadd.f32 %v3922_v19, %v690_v26  ;;  %v753_v55 = vmul.f32 %v751_v49, %v697_v24 }
 0x95e   :  { %3958 = vrcp.f32 %v701_v28  ;;  %v4310_v31 = vmul.f32 0.70710677, %v4307_v30  ;;  %v714_v41 = vand.u32 2147483648, %v701_v28  ;;  %v712_v43 = vand.u32 2147483647, %v701_v28 }
 0x95f   :  { %vm708_vm5 = vweird.f32 %v701_v28  ;;  %v755_v63 = vmul.f32 1.442695, %v753_v55 }
 0x960   :  { %v698_v33 = vand.u32 2147483647, %v4310_v31  ;;  %v715_v46 = vor.u32 1.1754944e-38, %v714_v41  ;;  %vm713_vm7 = vcmp.eq.f32.partialorder %v712_v43, 8.507059e+37  ;;  %vm764_vm14 = vcmp.lt.f32.partialorder %v4310_v31, 0.0 }
 0x961   :  { %v694_v41 = vmul.f32 0.5, %v4307_v30  ;;  %v944_v30 = vld [vmem:[#allocation8] sm:$0xff] }
 0x962   :  { %v700_v34 = vmul.f32 0.3275911, %v698_v33  ;;  %v752_v3 = vsub.f32 0.0, %v698_v33 }
 0x964   :  { %v3959_v36 = vpop.eup %3958  ;;  %v702_v38 = vadd.f32 1.0, %v700_v34  ;;  %v754_v13 = vmul.f32 %v752_v3, %v698_v33  ;;  %v945_v3 = vld [vmem:[#allocation8 + $0x8] sm:$0xff] }
 0x965   :  { %v704_v37 = vmul.f32 %v3959_v36, %v701_v28  ;;  %vm709_vm4 = vweird.f32 %v3959_v36 }
 0x966   :  { %3960 = vrcp.f32 %v702_v38  ;;  %vm710_vm6 = vmor %vm708_vm5, %vm709_vm4  ;;  %v729_v54 = vand.u32 2147483648, %v702_v38  ;;  %v727_v57 = vand.u32 2147483647, %v702_v38  ;;  %vm723_vm9 = vweird.f32 %v702_v38 }
 0x967   :  { %v705_v39 = vsub.f32 1.0, %v704_v37  ;;  %3962 = vpow2.f32 %v755_v63  ;;  %v757_v12 = vmul.f32 1.442695, %v754_v13 }
 0x968   :  { %v730_v62 = vor.u32 1.1754944e-38, %v729_v54  ;;  %vm728_vm11 = vcmp.eq.f32.partialorder %v727_v57, 8.507059e+37 }
 0x969   :  { %v706_v42 = vmul.f32 %v3959_v36, %v705_v39  ;;  %3964 = vpow2.f32 %v757_v12  ;;  %v946_v12 = vld [vmem:[#allocation8 + $0x10] sm:$0xff] }
 0x96b   :  { %v707_v44 = vadd.f32 %v3959_v36, %v706_v42 }
 0x96c   :  { %v3961_v4 = vpop.eup %3960 }
 0x96d   :  { %v711_v47 = vsel %vm710_vm6, %v3959_v36, %v707_v44  ;;  %v719_v5 = vmul.f32 %v3961_v4, %v702_v38  ;;  %vm724_vm8 = vweird.f32 %v3961_v4  ;;  %v3963_v19 = vpop.eup %3962  ;;  %vm917_vm6 = vcmask 1040384  }
 0x96e   :  { %v716_v48 = vsel %vm713_vm7, %v715_v46, %v711_v47  ;;  %vm725_vm10 = vmor %vm723_vm9, %vm724_vm8  ;;  %v3923_v46 = vld [vmem:[#allocation2 + $0x7] ss:$0 sm:$0xff] }
 0x96f   :  { %v733_v50 = vmul.f32 1.0614054, %v716_v48  ;;  %v720_v52 = vsub.f32 1.0, %v719_v5  ;;  %v3965_v34 = vpop.eup %3964 }
 0x971   :  { %v735_v53 = vadd.f32 -1.4531521, %v733_v50  ;;  %v721_v56 = vmul.f32 %v3961_v4, %v720_v52  ;;  %v950_v50 = vunpack.c.l.b16 %v944_v30 }
 0x973   :  { %v737_v58 = vmul.f32 %v735_v53, %v716_v48  ;;  %v722_v60 = vadd.f32 %v3961_v4, %v721_v56  ;;  %v956_v51 = vpack.c.b16 %v950_v50, %v950_v50 }
 0x975   :  { %v739_v61 = vadd.f32 1.4214138, %v737_v58  ;;  %v726_v0 = vsel %vm725_vm10, %v3961_v4, %v722_v60  ;;  %v967_v52 = vsel %vm965_vm15, %v956_v51, 0 }
 0x976   :  { %v731_v2 = vsel %vm728_vm11, %v730_v62, %v726_v0  ;;  %991 = vmatpush.bf16.msrb.mxu3 %v967_v52  ;;  %v919_v62 = vld [vmem:[%s4425_s2] sm:$0x3]  ;;  %v3927_v0 = vld [vmem:[#allocation2 + $0xb] ss:$0 sm:$0xff]  ;;  %s4145_s2 = smov [#allocation11]   ;;  %vm2801_vm11 = vcmask 8192  }
 0x977   :  { %v741_v1 = vmul.f32 %v739_v61, %v716_v48  ;;  %v734_v6 = vmul.f32 1.0614054, %v731_v2  ;;  %v3926_v61 = vld [vmem:[#allocation2 + $0xa] ss:$0 sm:$0xff]  ;;  %s2808_s19 = sshll.u32 %s4145_s2, 4  ;;  %s2809_s19 = int_to_ptr.vmem [resolvable:$true] %s2808_s19 }
 0x978   :  { %v924_v63 = vmul.f32 %v3926_v61, %v919_v62  ;;  %v2937_v61 = vld [vmem:[#allocation7 + $0x10] sm:$0xf] }
 0x979   :  { %v743_v7 = vadd.f32 -0.28449672, %v741_v1  ;;  %v736_v8 = vadd.f32 -1.4531521, %v734_v6  ;;  %v951_v6 = vunpack.c.h.b16 %v944_v30  ;;  %v2931_v30 = vld [vmem:[#allocation7 + $0x20] sm:$0xf0] }
 0x97a   :  { %v929_v1 = vadd.f32 %v3927_v0, %v924_v63  ;;  %v3701_v63 = vld [vmem:[#allocation7 + $0x24] sm:$0xf0]  ;;  %v3698_v0 = vld [vmem:[#allocation7 + $0x14] sm:$0xf] }
 0x97b   :  { %v745_v11 = vmul.f32 %v743_v7, %v716_v48  ;;  %v738_v14 = vmul.f32 %v736_v8, %v731_v2  ;;  %v952_v7 = vunpack.c.l.b16 %v945_v3  ;;  %v957_v8 = vpack.c.b16 %v951_v6, %v951_v6 }
 0x97d   :  { %v747_v15 = vadd.f32 0.2548296, %v745_v11  ;;  %v740_v16 = vadd.f32 1.4214138, %v738_v14  ;;  %v958_v11 = vpack.c.b16 %v952_v7, %v952_v7  ;;  %v970_v13 = vsel %vm965_vm15, %v957_v8, 0 }
 0x97e   :  { %1004 = vmatpush.bf16.msrb.mxu2 %v970_v13 }
 0x97f   :  { %v749_v17 = vmul.f32 %v747_v15, %v716_v48  ;;  %v742_v20 = vmul.f32 %v740_v16, %v731_v2  ;;  %v973_v14 = vsel %vm965_vm15, %v958_v11, 0  ;;  %v953_v15 = vunpack.c.h.b16 %v945_v3 }
 0x980   :  { %1017 = vmatpush.bf16.msrb.mxu0 %v973_v14 }
 0x981   :  { %v759_v23 = vmul.f32 %v3963_v19, %v749_v17  ;;  %v744_v24 = vadd.f32 -0.28449672, %v742_v20  ;;  %v959_v16 = vpack.c.b16 %v953_v15, %v953_v15  ;;  %v954_v19 = vunpack.c.l.b16 %v946_v12 }
 0x982   :  { %v955_v20 = vunpack.c.h.b16 %v946_v12  ;;  %v3155_v12 = vld [vmem:[#allocation10 + $0x168] sm:$0xf] }
 0x983   :  { %v761_v25 = vsub.f32 1.0, %v759_v23  ;;  %v746_v26 = vmul.f32 %v744_v24, %v731_v2  ;;  %v976_v17 = vsel %vm965_vm15, %v959_v16, 0  ;;  %v960_v23 = vpack.c.b16 %v954_v19, %v954_v19  ;;  %v3754_v19 = vld [vmem:[#allocation10 + $0x170] sm:$0xf0] }
 0x984   :  { %1030 = vmatpush.bf16.msra.mxu3 %v976_v17  ;;  %v961_v24 = vpack.c.b16 %v955_v20, %v955_v20  ;;  %v3156_v20 = vor.u32 %v3754_v19, %v3155_v12  ;;  %v3215_v12 = vld [vmem:[#allocation10 + $0x1e0] sm:$0xf] }
 0x985   :  { %v748_v27 = vadd.f32 0.2548296, %v746_v26  ;;  %v765_v28 = vsub.f32 0.0, %v761_v25 }
 0x986   :  { %v982_v26 = vsel %vm965_vm15, %v961_v24, 0  ;;  %v3924_v24 = vld [vmem:[#allocation2 + $0x8] ss:$0 sm:$0xff] }
 0x987   :  { %v750_v32 = vmul.f32 %v748_v27, %v731_v2  ;;  %v767_v33 = vsel %vm763_vm13, %v765_v28, %v761_v25  ;;  %v943_v2 = vpack.c.bf16 %v929_v1, %v929_v1  ;;  %v979_v25 = vsel %vm965_vm15, %v960_v23, 0  ;;  %1056 = vmatpush.bf16.msra.mxu0 %v982_v26  ;;  %v3143_v23 = vld [vmem:[#allocation10 + $0x150] sm:$0xf]  ;;  %v3751_v26 = vld [vmem:[#allocation10 + $0x158] sm:$0xf0] }
 0x988   :  { %v769_v38 = vadd.f32 1.0, %v767_v33  ;;  %1043 = vmatpush.bf16.msra.mxu2 %v979_v25 }
 0x989   :  { %v760_v35 = vmul.f32 %v3965_v34, %v750_v32  ;;  %2913 = vmatmul.msk.bf16.vlgmr.msrb.gmra.mxu3 %vm310_vm12, %v943_v2  ;;  %2914 = vmatmul.msk.bf16.vlgmr.msrb.gmra.mxu2 %vm310_vm12, %v943_v2  ;;  %v2945_v32 = vld [vmem:[#allocation7 + $0x30] sm:$0xf]  ;;  %v3705_v34 = vld [vmem:[#allocation7 + $0x44] sm:$0xf0] }
 0x98a   :  { %v771_v43 = vmul.f32 %v769_v38, %v693_v40  ;;  %2915 = vmatmul.msk.bf16.vlgmr.msrb.gmra.mxu0 %vm310_vm12, %v943_v2  ;;  %v2946_v33 = vor.u32 %v3705_v34, %v2945_v32  ;;  %v3706_v38 = vld [vmem:[#allocation7 + $0x4c] sm:$0xf0]  ;;  %v3059_v32 = vld [vmem:[#allocation10 + $0xa8] sm:$0xf]  ;;  %v3730_v34 = vld [vmem:[#allocation10 + $0xb0] sm:$0xf0] }
 0x98b   :  { %v762_v36 = vsub.f32 1.0, %v760_v35  ;;  %v3702_v35 = vld [vmem:[#allocation7 + $0x34] sm:$0xf] }
 0x98c   :  { %1131 = vmatpush.bf16.msrb.mxu3 %v2946_v33  ;;  %v3060_v33 = vor.u32 %v3730_v34, %v3059_v32  ;;  %v3011_v32 = vld [vmem:[#allocation10 + $0x48] sm:$0xf] }
 0x98d   :  { %v766_v37 = vsub.f32 0.0, %v762_v36 }
 0x98f   :  { %v768_v39 = vsel %vm764_vm14, %v766_v37, %v762_v36  ;;  %v2947_v36 = vld [vmem:[#allocation7 + $0x48] sm:$0xf0]  ;;  %v2953_v37 = vld [vmem:[#allocation7 + $0x38] sm:$0xf] }
 0x990   :  { %v770_v42 = vadd.f32 1.0, %v768_v39  ;;  %v2950_v40 = vor.u32 %v3702_v35, %v2947_v36  ;;  %v3131_v36 = vld [vmem:[#allocation10 + $0x138] sm:$0xf] }
 0x992   :  { %v772_v44 = vmul.f32 %v770_v42, %v694_v41  ;;  %v2954_v41 = vor.u32 %v3706_v38, %v2953_v37  ;;  %v3703_v42 = vld [vmem:[#allocation7 + $0x3c] sm:$0xf]  ;;  %1144 = vmatpush.bf16.msra.mxu1 %v2950_v40  ;;  %v3727_v40 = vld [vmem:[#allocation10 + $0x98] sm:$0xf0] }
 0x993   :  { %v3748_v37 = vld [vmem:[#allocation10 + $0x140] sm:$0xf0] }
 0x994   :  { %v773_v45 = vpack.c.bf16 %v772_v44, %v771_v43  ;;  %v2955_v43 = vld [vmem:[#allocation7 + $0x50] sm:$0xf0]  ;;  %1157 = vmatpush.bf16.msrb.mxu2 %v2954_v41 }
 0x995   :  { %v2958_v44 = vor.u32 %v3703_v42, %v2955_v43  ;;  %v3925_v41 = vld [vmem:[#allocation2 + $0x9] ss:$0 sm:$0xff] }
 0x996   :  { %850 = vmatmul.bf16.vlgmr.msrb.gmra.mxu1 %v773_v45  ;;  %v2921_v45 = vld [vmem:[#allocation7] sm:$0xf] }
 0x997   :  { %1170 = vmatpush.bf16.msrb.mxu0 %v2958_v44  ;;  %v3132_v44 = vor.u32 %v3748_v37, %v3131_v36  ;;  %v3766_v36 = vld [vmem:[#allocation10 + $0x1d0] sm:$0xf0] }
 0x999   :  { %2916 = vmatmul.msk.bf16.vlgmr.msra.gmra.mxu3 %vm310_vm12, %v943_v2  ;;  %2917 = vmatmul.msk.bf16.vlgmr.msra.gmra.mxu2 %vm310_vm12, %v943_v2 }
 0x99a   :  { %2918 = vmatmul.msk.bf16.vlgmr.msra.gmra.mxu0 %vm310_vm12, %v943_v2  ;;  %v2938_v2 = vor.u32 %v3701_v63, %v2937_v61  ;;  %v3227_v63 = vld [vmem:[#allocation10 + $0x1f8] sm:$0xf] }
 0xa13   :  { %v851_v4 = vpop.f32.mrf.mxu1 }
 0xa14   :  { %v852_v47 = vadd.f32 %v3923_v46, %v851_v4  ;;  %v3696_v4 = vld [vmem:[#allocation7 + $0x4] sm:$0xf] }
 0xa16   :  { %v856_v22 = vadd.f32 %v852_v47, %v4294_v18 }
 0xa18   :  { %v860_v48 = vsel %vm176_vm3, %v856_v22, 0.0 }
 0xa19   :  { %861 = vadd.xlane.f32.xlu0 %v860_v48  ;;  %v2929_v48 = vld [vmem:[#allocation7 + $0x8] sm:$0xf] }
 0xa1b   :  { %v853_v49 = vpop.f32.mrf.mxu1 }
 0xa1c   :  { %v854_v31 = vadd.f32 %v3923_v46, %v853_v49  ;;  %v3699_v46 = vld [vmem:[#allocation7 + $0x14] sm:$0xf0]  ;;  %v3700_v49 = vld [vmem:[#allocation7 + $0x1c] sm:$0xf0] }
 0xa1d   :  { %v2922_v47 = vor.u32 %v3699_v46, %v2921_v45  ;;  %v3119_v45 = vld [vmem:[#allocation10 + $0x120] sm:$0xf]  ;;  %v3745_v46 = vld [vmem:[#allocation10 + $0x128] sm:$0xf0] }
 0xa1e   :  { %v857_v5 = vadd.f32 %v854_v31, %v4296_v10 }
 0xa1f   :  { %1132 = vmatpush.bf16.msrb.mxu3 %v2922_v47  ;;  %v3724_v47 = vld [vmem:[#allocation10 + $0x80] sm:$0xf0] }
 0xa20   :  { %v863_v21 = vsel %vm176_vm3, %v857_v5, 0.0 }
 0xa21   :  { %864 = vadd.xlane.f32.xlu1 %v863_v21  ;;  %v3697_v21 = vld [vmem:[#allocation7 + $0xc] sm:$0xf] }
 0xa22   :  { %v2934_v51 = vor.u32 %v3697_v21, %v2931_v30  ;;  %v3251_v21 = vld [vmem:[#allocation10 + $0x228] sm:$0xf]  ;;  %v3778_v30 = vld [vmem:[#allocation10 + $0x230] sm:$0xf0] }
 0xa24   :  { %1171 = vmatpush.bf16.msrb.mxu0 %v2934_v51 }
 0xa28   :  { %2216 = vmatpush.bf16.msra.mxu0 %v3156_v20  ;;  %v3769_v20 = vld [vmem:[#allocation10 + $0x1e8] sm:$0xf0] }
 0xa8c   :  { %v862_v53 = vpop.xlane.xlu0 %861 }
 0xa8d   :  { %v866_v18 = vmul.f32 %v862_v53, %v4220_v29 }
 0xa8f   :  { %v4323_v54 = vsub.f32 %v856_v22, %v866_v18  ;;  %v2923_v22 = vld [vmem:[#allocation7 + $0x18] sm:$0xf0] }
 0xa90   :  { %v2926_v31 = vor.u32 %v3696_v4, %v2923_v22  ;;  %v3035_v4 = vld [vmem:[#allocation10 + $0x78] sm:$0xf] }
 0xa91   :  { %v870_v55 = vmul.f32 %v4323_v54, %v4323_v54 }
 0xa92   :  { %1145 = vmatpush.bf16.msra.mxu1 %v2926_v31  ;;  %v3036_v31 = vor.u32 %v3724_v47, %v3035_v4  ;;  %v3763_v47 = vld [vmem:[#allocation10 + $0x1b8] sm:$0xf0] }
 0xa93   :  { %v872_v10 = vsel %vm176_vm3, %v870_v55, 0.0  ;;  %v2961_v55 = vld [vmem:[#allocation7 + $0x40] sm:$0xf] }
 0xa94   :  { %v865_v56 = vpop.xlane.xlu1 %864  ;;  %873 = vadd.xlane.f32.xlu1 %v872_v10  ;;  %v3707_v10 = vld [vmem:[#allocation7 + $0x54] sm:$0xf0] }
 0xa95   :  { %v867_v57 = vmul.f32 %v865_v56, %v4220_v29 }
 0xa97   :  { %v4329_v58 = vsub.f32 %v857_v5, %v867_v57  ;;  %v2930_v5 = vor.u32 %v3700_v49, %v2929_v48  ;;  %v2962_v57 = vor.u32 %v3707_v10, %v2961_v55  ;;  %v3347_v48 = vld [vmem:[#allocation10 + $0x2e8] sm:$0xf]  ;;  %v3802_v49 = vld [vmem:[#allocation10 + $0x2f0] sm:$0xf0]  ;;  %v3252_v55 = vor.u32 %v3778_v30, %v3251_v21  ;;  %v3799_v10 = vld [vmem:[#allocation10 + $0x2d8] sm:$0xf0] }
 0xa98   :  { %v3539_v21 = vld [vmem:[#allocation10 + $0x468] sm:$0xf] }
 0xa99   :  { %v871_v59 = vmul.f32 %v4329_v58, %v4329_v58  ;;  %1158 = vmatpush.bf16.msrb.mxu2 %v2930_v5  ;;  %1183 = vmatpush.bf16.msra.mxu3 %v2962_v57  ;;  %v3775_v57 = vld [vmem:[#allocation10 + $0x218] sm:$0xf0] }
 0xa9b   :  { %v875_v60 = vsel %vm176_vm3, %v871_v59, 0.0  ;;  %v3704_v59 = vld [vmem:[#allocation7 + $0x44] sm:$0xf] }
 0xa9c   :  { %876 = vadd.xlane.f32.xlu2 %v875_v60  ;;  %v2963_v60 = vld [vmem:[#allocation7 + $0x58] sm:$0xf0] }
 0xa9d   :  { %v2966_v62 = vor.u32 %v3704_v59, %v2963_v60  ;;  %1184 = vmatpush.bf16.msra.mxu3 %v2938_v2  ;;  %2203 = vmatpush.bf16.msra.mxu2 %v3060_v33  ;;  %v3323_v60 = vld [vmem:[#allocation10 + $0x2b8] sm:$0xf]  ;;  %v3203_v33 = vld [vmem:[#allocation10 + $0x1c8] sm:$0xf] }
 0xa9f   :  { %1196 = vmatpush.bf16.msrb.mxu1 %v2966_v62  ;;  %v3796_v62 = vld [vmem:[#allocation10 + $0x2c0] sm:$0xf0] }
 0xb07   :  { %v874_v27 = vpop.xlane.xlu1 %873 }
 0xb08   :  { %v878_v28 = vmul.f32 %v874_v27, %v4220_v29 }
 0xb0a   :  { %v880_v39 = vadd.f32 1e-12, %v878_v28  ;;  %v3144_v28 = vor.u32 %v3751_v26, %v3143_v23  ;;  %v3095_v23 = vld [vmem:[#allocation10 + $0xf0] sm:$0xf] }
 0xb0c   :  { %3966 = vrsqrt.f32 %v880_v39  ;;  %vm888_vm0 = vweird.f32 %v880_v39  ;;  %2217 = vmatpush.bf16.msra.mxu0 %v3144_v28  ;;  %v3787_v28 = vld [vmem:[#allocation10 + $0x278] sm:$0xf0] }
 0xb0f   :  { %v877_v50 = vpop.xlane.xlu2 %876 }
 0xb10   :  { %v879_v52 = vmul.f32 %v877_v50, %v4220_v29  ;;  %v2939_v29 = vld [vmem:[#allocation7 + $0x28] sm:$0xf0]  ;;  %2218 = vmatpush.bf16.msra.mxu0 %v3132_v44  ;;  %v3120_v50 = vor.u32 %v3745_v46, %v3119_v45  ;;  %v3715_v45 = vld [vmem:[#allocation10 + $0x38] sm:$0xf0]  ;;  %v3191_v46 = vld [vmem:[#allocation10 + $0x1b0] sm:$0xf] }
 0xb11   :  { %v2942_v3 = vor.u32 %v3698_v0, %v2939_v29  ;;  %v3772_v0 = vld [vmem:[#allocation10 + $0x200] sm:$0xf0]  ;;  %v3311_v29 = vld [vmem:[#allocation10 + $0x2a0] sm:$0xf] }
 0xb12   :  { %v3967_v53 = vpop.eup %3966  ;;  %v881_v18 = vadd.f32 1e-12, %v879_v52  ;;  %v3228_v2 = vor.u32 %v3772_v0, %v3227_v63  ;;  %v3750_v63 = vld [vmem:[#allocation10 + $0x154] sm:$0xf] }
 0xb13   :  { %v883_v56 = vmul.f32 %v3967_v53, %v880_v39  ;;  %1197 = vmatpush.bf16.msrb.mxu1 %v2942_v3  ;;  %vm889_vm12 = vweird.f32 %v3967_v53  ;;  %v3047_v39 = vld [vmem:[#allocation10 + $0x90] sm:$0xf]  ;;  %v3793_v3 = vld [vmem:[#allocation10 + $0x2a8] sm:$0xf0] }
 0xb14   :  { %3968 = vrsqrt.f32 %v881_v18  ;;  %vm890_vm1 = vmor %vm888_vm0, %vm889_vm12  ;;  %vm898_vm4 = vweird.f32 %v881_v18  ;;  %2219 = vmatpush.bf16.msra.mxu0 %v3120_v50  ;;  %v3850_v50 = vld [vmem:[#allocation10 + $0x470] sm:$0xf0] }
 0xb15   :  { %v884_v1 = vmul.f32 %v3967_v53, %v883_v56  ;;  %v3239_v56 = vld [vmem:[#allocation10 + $0x210] sm:$0xf] }
 0xb16   :  { %v3240_v61 = vor.u32 %v3775_v57, %v3239_v56  ;;  %v3179_v56 = vld [vmem:[#allocation10 + $0x198] sm:$0xf] }
 0xb17   :  { %v885_v6 = vmul.f32 0.5, %v884_v1  ;;  %v3324_v1 = vor.u32 %v3796_v62, %v3323_v60  ;;  %v3847_v62 = vld [vmem:[#allocation10 + $0x458] sm:$0xf0] }
 0xb19   :  { %v886_v7 = vsub.f32 1.5, %v885_v6  ;;  %v3312_v6 = vor.u32 %v3793_v3, %v3311_v29  ;;  %v3709_v29 = vld [vmem:[#allocation10 + $0x8] sm:$0xf0] }
 0xb1a   :  { %v3969_v8 = vpop.eup %3968 }
 0xb1b   :  { %v893_v11 = vmul.f32 %v3969_v8, %v881_v18  ;;  %v887_v13 = vmul.f32 %v3967_v53, %v886_v7  ;;  %vm899_vm2 = vweird.f32 %v3969_v8  ;;  %v3335_v18 = vld [vmem:[#allocation10 + $0x2d0] sm:$0xf]  ;;  %v3107_v7 = vld [vmem:[#allocation10 + $0x108] sm:$0xf] }
 0xb1c   :  { %vm900_vm5 = vmor %vm898_vm4, %vm899_vm2  ;;  %v3336_v59 = vor.u32 %v3799_v10, %v3335_v18  ;;  %v3712_v10 = vld [vmem:[#allocation10 + $0x20] sm:$0xf0] }
 0xb1d   :  { %v894_v14 = vmul.f32 %v3969_v8, %v893_v11  ;;  %v891_v16 = vsel %vm890_vm1, %v3967_v53, %v887_v13  ;;  %v3348_v53 = vor.u32 %v3802_v49, %v3347_v48  ;;  %v3299_v11 = vld [vmem:[#allocation10 + $0x288] sm:$0xf]  ;;  %v3733_v48 = vld [vmem:[#allocation10 + $0xc8] sm:$0xf0]  ;;  %v3192_v49 = vor.u32 %v3763_v47, %v3191_v46  ;;  %v3838_v47 = vld [vmem:[#allocation10 + $0x410] sm:$0xf0] }
 0xb1e   :  { %v902_v27 = vmul.f32 %v891_v16, %v4323_v54  ;;  %v3048_v54 = vor.u32 %v3727_v40, %v3047_v39  ;;  %v3023_v16 = vld [vmem:[#allocation10 + $0x60] sm:$0xf]  ;;  %v3083_v39 = vld [vmem:[#allocation10 + $0xd8] sm:$0xf]  ;;  %v3736_v40 = vld [vmem:[#allocation10 + $0xe0] sm:$0xf0] }
 0xb1f   :  { %v895_v15 = vmul.f32 0.5, %v894_v14  ;;  %v3790_v14 = vld [vmem:[#allocation10 + $0x290] sm:$0xf0]  ;;  %v3491_v46 = vld [vmem:[#allocation10 + $0x408] sm:$0xf] }
 0xb20   :  { %v907_v42 = vmul.f32 %v3924_v24, %v902_v27  ;;  %2204 = vmatpush.bf16.msra.mxu2 %v3048_v54  ;;  %v3287_v27 = vld [vmem:[#allocation10 + $0x270] sm:$0xf] }
 0xb21   :  { %v896_v17 = vsub.f32 1.5, %v895_v15  ;;  %v3300_v15 = vor.u32 %v3790_v14, %v3299_v11  ;;  %v3288_v34 = vor.u32 %v3787_v28, %v3287_v27  ;;  %v2999_v54 = vld [vmem:[#allocation10 + $0x30] sm:$0xf]  ;;  %v3443_v11 = vld [vmem:[#allocation10 + $0x3a8] sm:$0xf] }
 0xb22   :  { %v3000_v4 = vor.u32 %v3715_v45, %v2999_v54  ;;  %v3826_v14 = vld [vmem:[#allocation10 + $0x3b0] sm:$0xf0]  ;;  %v3431_v27 = vld [vmem:[#allocation10 + $0x390] sm:$0xf]  ;;  %v3823_v28 = vld [vmem:[#allocation10 + $0x398] sm:$0xf0] }
 0xb23   :  { %v897_v25 = vmul.f32 %v3969_v8, %v896_v17  ;;  %v3721_v17 = vld [vmem:[#allocation10 + $0x68] sm:$0xf0]  ;;  %v3723_v54 = vld [vmem:[#allocation10 + $0x7c] sm:$0xf]  ;;  %v3037_v45 = vld [vmem:[#allocation10 + $0x84] sm:$0xf0] }
 0xb24   :  { %2205 = vmatpush.bf16.msra.mxu2 %v3036_v31  ;;  %v3024_v19 = vor.u32 %v3721_v17, %v3023_v16  ;;  %v3061_v16 = vld [vmem:[#allocation10 + $0xb4] sm:$0xf0]  ;;  %v3444_v17 = vor.u32 %v3826_v14, %v3443_v11  ;;  %v3717_v11 = vld [vmem:[#allocation10 + $0x4c] sm:$0xf] }
 0xb25   :  { %v901_v35 = vsel %vm900_vm5, %v3969_v8, %v897_v25  ;;  %v3742_v8 = vld [vmem:[#allocation10 + $0x110] sm:$0xf0]  ;;  %v3216_v25 = vor.u32 %v3769_v20, %v3215_v12  ;;  %v3844_v20 = vld [vmem:[#allocation10 + $0x440] sm:$0xf0]  ;;  %v3013_v14 = vld [vmem:[#allocation10 + $0x54] sm:$0xf0] }
 0xb26   :  { %v903_v38 = vmul.f32 %v901_v35, %v4329_v58  ;;  %v912_v58 = vadd.f32 %v3925_v41, %v907_v42  ;;  %v3108_v13 = vor.u32 %v3742_v8, %v3107_v7  ;;  %v3718_v35 = vld [vmem:[#allocation10 + $0x50] sm:$0xf0]  ;;  %v3084_v42 = vor.u32 %v3736_v40, %v3083_v39  ;;  %v3167_v7 = vld [vmem:[#allocation10 + $0x180] sm:$0xf]  ;;  %v3757_v8 = vld [vmem:[#allocation10 + $0x188] sm:$0xf0] }
 0xb27   :  { %v3012_v37 = vor.u32 %v3718_v35, %v3011_v32  ;;  %v3726_v32 = vld [vmem:[#allocation10 + $0x94] sm:$0xf]  ;;  %v3049_v35 = vld [vmem:[#allocation10 + $0x9c] sm:$0xf0]  ;;  %v3121_v40 = vld [vmem:[#allocation10 + $0x12c] sm:$0xf0] }
 0xb28   :  { %v908_v43 = vmul.f32 %v3924_v24, %v903_v38  ;;  %2220 = vmatpush.bf16.msra.mxu0 %v3108_v13  ;;  %v3739_v24 = vld [vmem:[#allocation10 + $0xf8] sm:$0xf0]  ;;  %2206 = vmatpush.bf16.msra.mxu2 %v3024_v19  ;;  %v3204_v38 = vor.u32 %v3766_v36, %v3203_v33  ;;  %v3168_v13 = vor.u32 %v3757_v8, %v3167_v7  ;;  %v3515_v19 = vld [vmem:[#allocation10 + $0x438] sm:$0xf]  ;;  %v3503_v36 = vld [vmem:[#allocation10 + $0x420] sm:$0xf] }
 0xb29   :  { %v3096_v26 = vor.u32 %v3739_v24, %v3095_v23  ;;  %v3747_v23 = vld [vmem:[#allocation10 + $0x13c] sm:$0xf]  ;;  %v3516_v24 = vor.u32 %v3844_v20, %v3515_v19  ;;  %v3052_v33 = vor.u32 %v3726_v32, %v3049_v35  ;;  %v3395_v7 = vld [vmem:[#allocation10 + $0x348] sm:$0xf]  ;;  %v3814_v8 = vld [vmem:[#allocation10 + $0x350] sm:$0xf0] }
 0xb2a   :  { %v913_v22 = vadd.f32 %v3925_v41, %v908_v43  ;;  %v3275_v41 = vld [vmem:[#allocation10 + $0x258] sm:$0xf]  ;;  %v3784_v43 = vld [vmem:[#allocation10 + $0x260] sm:$0xf0]  ;;  %v3735_v19 = vld [vmem:[#allocation10 + $0xdc] sm:$0xf] }
 0xb2b   :  { %v3276_v44 = vor.u32 %v3784_v43, %v3275_v41  ;;  %v3419_v41 = vld [vmem:[#allocation10 + $0x378] sm:$0xf]  ;;  %v3085_v20 = vld [vmem:[#allocation10 + $0xe4] sm:$0xf0]  ;;  %v3829_v35 = vld [vmem:[#allocation10 + $0x3c8] sm:$0xf0] }
 0xb2c   :  { %v915_v5 = vrot.slane %v913_v22, 7  ;;  %2221 = vmatpush.bf16.msra.mxu0 %v3096_v26  ;;  %2207 = vmatpush.bf16.msra.mxu2 %v3012_v37  ;;  %v3071_v22 = vld [vmem:[#allocation10 + $0xc0] sm:$0xf]  ;;  %v3841_v37 = vld [vmem:[#allocation10 + $0x428] sm:$0xf0] }
 0xb2d   :  { %v3072_v31 = vor.u32 %v3733_v48, %v3071_v22  ;;  %v3504_v39 = vor.u32 %v3841_v37, %v3503_v36  ;;  %v3741_v22 = vld [vmem:[#allocation10 + $0x10c] sm:$0xf]  ;;  %v3109_v48 = vld [vmem:[#allocation10 + $0x114] sm:$0xf0]  ;;  %v3073_v37 = vld [vmem:[#allocation10 + $0xcc] sm:$0xf0] }
 0xb2e   :  { %v918_v51 = vsel %vm917_vm6, %v912_v58, %v915_v5  ;;  %v3263_v58 = vld [vmem:[#allocation10 + $0x240] sm:$0xf]  ;;  %v3781_v5 = vld [vmem:[#allocation10 + $0x248] sm:$0xf0] }
 0xb2f   :  { %v930_v52 = vpack.c.bf16 %v918_v51, %v918_v51  ;;  %v3264_v30 = vor.u32 %v3781_v5, %v3263_v58  ;;  %v3753_v51 = vld [vmem:[#allocation10 + $0x16c] sm:$0xf]  ;;  %v4358_v58 = vpop.f32.mrf.mxu3  ;;  %v3407_v5 = vld [vmem:[#allocation10 + $0x360] sm:$0xf] }
 0xb30   :  { %2222 = vmatpush.bf16.msra.mxu0 %v3084_v42  ;;  %2208 = vmatpush.bf16.msra.mxu2 %v3000_v4  ;;  %v3820_v42 = vld [vmem:[#allocation10 + $0x380] sm:$0xf0]  ;;  %v3040_v4 = vor.u32 %v3723_v54, %v3037_v45  ;;  %v3359_v54 = vld [vmem:[#allocation10 + $0x300] sm:$0xf]  ;;  %v3805_v45 = vld [vmem:[#allocation10 + $0x308] sm:$0xf0] }
 0xb31   :  { %2967 = vmatmul.msk.bf16.vlgmr.msrb.gmra.mxu3 %vm176_vm3, %v930_v52  ;;  %2968 = vmatmul.msk.bf16.vlgmr.msra.gmra.mxu1 %vm176_vm3, %v930_v52 }
 0xb32   :  { %2969 = vmatmul.msk.bf16.vlgmr.msrb.gmra.mxu2 %vm176_vm3, %v930_v52  ;;  %2970 = vmatmul.msk.bf16.vlgmr.msrb.gmra.mxu0 %vm176_vm3, %v930_v52 }
 0xb33   :  { %2242 = vmatpush.bf16.msra.mxu1 %v3348_v53  ;;  %2229 = vmatpush.bf16.msrb.mxu3 %v3252_v55  ;;  %v3540_v53 = vor.u32 %v3850_v50, %v3539_v21  ;;  %v2987_v55 = vld [vmem:[#allocation10 + $0x18] sm:$0xf]  ;;  %v3817_v21 = vld [vmem:[#allocation10 + $0x368] sm:$0xf0] }
 0xb34   :  { %2223 = vmatpush.bf16.msra.mxu0 %v3072_v31  ;;  %v2988_v57 = vor.u32 %v3712_v10, %v2987_v55  ;;  %v3112_v31 = vor.u32 %v3741_v22, %v3109_v48  ;;  %v3408_v50 = vor.u32 %v3817_v21, %v3407_v5  ;;  %v4362_v55 = vpop.f32.mrf.mxu2  ;;  %v4370_v48 = vld [vmem:[#allocation2 + $0xc] sm:$0x3f] }
 0xb35   :  { %v1208_v5 = vperm.slane %v4370_v48, 3 }
 0xb36   :  { %2209 = vmatpush.bf16.msra.mxu2 %v2988_v57 }
 0xb37   :  { %2243 = vmatpush.bf16.msra.mxu1 %v3336_v59  ;;  %2230 = vmatpush.bf16.msrb.mxu3 %v3240_v61  ;;  %v3760_v59 = vld [vmem:[#allocation10 + $0x1a0] sm:$0xf0]  ;;  %v3527_v61 = vld [vmem:[#allocation10 + $0x450] sm:$0xf] }
 0xb38   :  { %2268 = vmatpush.bf16.msrb.mxu0 %v3540_v53  ;;  %v3180_v60 = vor.u32 %v3760_v59, %v3179_v56  ;;  %v3528_v0 = vor.u32 %v3847_v62, %v3527_v61 }
 0xb3b   :  { %2244 = vmatpush.bf16.msra.mxu1 %v3324_v1  ;;  %2231 = vmatpush.bf16.msrb.mxu3 %v3228_v2  ;;  %v3145_v1 = vld [vmem:[#allocation10 + $0x15c] sm:$0xf0] }
 0xb3c   :  { %v2975_v2 = vld [vmem:[#allocation10] sm:$0xf]  ;;  %v3148_v3 = vor.u32 %v3750_v63, %v3145_v1  ;;  %2269 = vmatpush.bf16.msrb.mxu0 %v3528_v0  ;;  %v1008_v56 = vpop.f32.mrf.mxu2  ;;  %v3479_v63 = vld [vmem:[#allocation10 + $0x3f0] sm:$0xf]  ;;  %v3835_v0 = vld [vmem:[#allocation10 + $0x3f8] sm:$0xf0] }
 0xb3d   :  { %v3738_v1 = vld [vmem:[#allocation10 + $0xf4] sm:$0xf]  ;;  %v3849_v56 = vld [vmem:[#allocation10 + $0x46c] sm:$0xf] }
 0xb3f   :  { %2245 = vmatpush.bf16.msra.mxu1 %v3312_v6  ;;  %2232 = vmatpush.bf16.msrb.mxu3 %v3216_v25  ;;  %v2976_v6 = vor.u32 %v3709_v29, %v2975_v2  ;;  %v3133_v25 = vld [vmem:[#allocation10 + $0x144] sm:$0xf0]  ;;  %v3480_v29 = vor.u32 %v3835_v0, %v3479_v63  ;;  %v1205_v63 = vperm.slane %v4370_v48, 0 }
 0xb40   :  { %v3136_v26 = vor.u32 %v3747_v23, %v3133_v25  ;;  %2270 = vmatpush.bf16.msrb.mxu0 %v3516_v24  ;;  %v3088_v23 = vor.u32 %v3735_v19, %v3085_v20  ;;  %v3383_v24 = vld [vmem:[#allocation10 + $0x330] sm:$0xf]  ;;  %v3811_v25 = vld [vmem:[#allocation10 + $0x338] sm:$0xf0]  ;;  %v3777_v19 = vld [vmem:[#allocation10 + $0x22c] sm:$0xf] }
 0xb41   :  { %2971 = vmatmul.msk.bf16.vlgmr.msra.gmra.mxu3 %vm176_vm3, %v930_v52  ;;  %2972 = vmatmul.msk.bf16.vlgmr.msrb.gmra.mxu1 %vm176_vm3, %v930_v52  ;;  %v3157_v52 = vld [vmem:[#allocation10 + $0x174] sm:$0xf0]  ;;  %vm2767_vm3 = vcmask 254976  }
 0xb42   :  { %v3160_v18 = vor.u32 %v3753_v51, %v3157_v52  ;;  %2210 = vmatpush.bf16.msra.mxu2 %v2976_v6  ;;  %v3025_v51 = vld [vmem:[#allocation10 + $0x6c] sm:$0xf0]  ;;  %v4360_v52 = vpop.f32.mrf.mxu0  ;;  %v3253_v20 = vld [vmem:[#allocation10 + $0x234] sm:$0xf0] }
 0xb43   :  { %2246 = vmatpush.bf16.msra.mxu1 %v3300_v15  ;;  %2233 = vmatpush.bf16.msrb.mxu3 %v3204_v38  ;;  %v3729_v15 = vld [vmem:[#allocation10 + $0xac] sm:$0xf]  ;;  %v3744_v38 = vld [vmem:[#allocation10 + $0x124] sm:$0xf] }
 0xb44   :  { %v3064_v12 = vor.u32 %v3729_v15, %v3061_v16  ;;  %v3124_v43 = vor.u32 %v3744_v38, %v3121_v40  ;;  %2271 = vmatpush.bf16.msrb.mxu0 %v3504_v39  ;;  %v4368_v61 = vpop.f32.mrf.mxu2  ;;  %v3016_v15 = vor.u32 %v3717_v11, %v3013_v14  ;;  %v3467_v16 = vld [vmem:[#allocation10 + $0x3d8] sm:$0xf]  ;;  %v3808_v40 = vld [vmem:[#allocation10 + $0x320] sm:$0xf0] }
 0xb45   :  { %v3371_v39 = vld [vmem:[#allocation10 + $0x318] sm:$0xf] }
 0xb46   :  { %2255 = vmatpush.bf16.msrb.mxu2 %v3444_v17  ;;  %v3832_v17 = vld [vmem:[#allocation10 + $0x3e0] sm:$0xf0] }
 0xb47   :  { %2247 = vmatpush.bf16.msra.mxu1 %v3288_v34  ;;  %2234 = vmatpush.bf16.msrb.mxu3 %v3192_v49  ;;  %v3432_v34 = vor.u32 %v3823_v28, %v3431_v27  ;;  %v3492_v49 = vor.u32 %v3838_v47, %v3491_v46  ;;  %v3384_v27 = vor.u32 %v3811_v25, %v3383_v24  ;;  %v3001_v28 = vld [vmem:[#allocation10 + $0x3c] sm:$0xf0]  ;;  %v2977_v47 = vld [vmem:[#allocation10 + $0xc] sm:$0xf0]  ;;  %v3825_v24 = vld [vmem:[#allocation10 + $0x3ac] sm:$0xf] }
 0xb48   :  { %v3360_v46 = vor.u32 %v3805_v45, %v3359_v54  ;;  %v3445_v25 = vld [vmem:[#allocation10 + $0x3b4] sm:$0xf0]  ;;  %v1210_v45 = vperm.slane %v4370_v48, 5 }
 0xb49   :  { %2272 = vmatpush.bf16.msrb.mxu0 %v3492_v49  ;;  %v1206_v49 = vperm.slane %v4370_v48, 1 }
 0xb4a   :  { %2256 = vmatpush.bf16.msrb.mxu2 %v3432_v34  ;;  %v1021_v10 = vpop.f32.mrf.mxu0  ;;  %v3455_v34 = vld [vmem:[#allocation10 + $0x3c0] sm:$0xf] }
 0xb4b   :  { %2248 = vmatpush.bf16.msra.mxu1 %v3276_v44  ;;  %2235 = vmatpush.bf16.msrb.mxu3 %v3180_v60  ;;  %v3420_v44 = vor.u32 %v3820_v42, %v3419_v41  ;;  %v3456_v36 = vor.u32 %v3829_v35, %v3455_v34  ;;  %v3711_v41 = vld [vmem:[#allocation10 + $0x1c] sm:$0xf]  ;;  %v3372_v42 = vor.u32 %v3808_v40, %v3371_v39  ;;  %v3241_v39 = vld [vmem:[#allocation10 + $0x21c] sm:$0xf0] }
 0xb4c   :  { %v1047_v2 = vpop.f32.mrf.mxu2  ;;  %v3256_v34 = vor.u32 %v3777_v19, %v3253_v20  ;;  %v3843_v35 = vld [vmem:[#allocation10 + $0x43c] sm:$0xf]  ;;  %v3289_v19 = vld [vmem:[#allocation10 + $0x27c] sm:$0xf0] }
 0xb4d   :  { %2273 = vmatpush.bf16.msrb.mxu0 %v3480_v29  ;;  %v1207_v2 = vperm.slane %v4370_v48, 2 }
 0xb4e   :  { %2257 = vmatpush.bf16.msrb.mxu2 %v3420_v44 }
 0xb4f   :  { %2249 = vmatpush.bf16.msra.mxu1 %v3264_v30  ;;  %2236 = vmatpush.bf16.msrb.mxu3 %v3168_v13  ;;  %v3720_v30 = vld [vmem:[#allocation10 + $0x64] sm:$0xf]  ;;  %v3396_v13 = vor.u32 %v3814_v8, %v3395_v7  ;;  %v3798_v7 = vld [vmem:[#allocation10 + $0x2d4] sm:$0xf]  ;;  %v3337_v8 = vld [vmem:[#allocation10 + $0x2dc] sm:$0xf0] }
 0xb50   :  { %v3028_v53 = vor.u32 %v3720_v30, %v3025_v51 }
 0xb52   :  { %2258 = vmatpush.bf16.msrb.mxu2 %v3408_v50  ;;  %v4366_v59 = vpop.f32.mrf.mxu0 }
 0xb53   :  { %2294 = vmatpush.bf16.msrb.mxu1 %v3160_v18  ;;  %2281 = vmatpush.bf16.msra.mxu3 %v3064_v12  ;;  %v995_v18 = vpop.f32.mrf.mxu3  ;;  %v3468_v12 = vor.u32 %v3832_v17, %v3467_v16  ;;  %v3529_v16 = vld [vmem:[#allocation10 + $0x45c] sm:$0xf0] }
 0xb54   :  { %v3349_v18 = vld [vmem:[#allocation10 + $0x2f4] sm:$0xf0] }
 0xb55   :  { %2274 = vmatpush.bf16.msrb.mxu0 %v3468_v12 }
 0xb56   :  { %2259 = vmatpush.bf16.msrb.mxu2 %v3396_v13 }
 0xb57   :  { %2295 = vmatpush.bf16.msrb.mxu1 %v3148_v3  ;;  %2282 = vmatpush.bf16.msra.mxu3 %v3052_v33  ;;  %v3097_v3 = vld [vmem:[#allocation10 + $0xfc] sm:$0xf0]  ;;  %v3732_v33 = vld [vmem:[#allocation10 + $0xc4] sm:$0xf] }
 0xb58   :  { %v3100_v6 = vor.u32 %v3738_v1, %v3097_v3  ;;  %v3076_v38 = vor.u32 %v3732_v33, %v3073_v37  ;;  %v3517_v33 = vld [vmem:[#allocation10 + $0x444] sm:$0xf0]  ;;  %v3448_v37 = vor.u32 %v3825_v24, %v3445_v25 }
 0xb59   :  { %2275 = vmatpush.bf16.msrb.mxu0 %v3456_v36 }
 0xb5a   :  { %v1060_v62 = vpop.f32.mrf.mxu0  ;;  %2260 = vmatpush.bf16.msrb.mxu2 %v3384_v27 }
 0xb5b   :  { %2296 = vmatpush.bf16.msrb.mxu1 %v3136_v26  ;;  %2283 = vmatpush.bf16.msra.mxu3 %v3040_v4  ;;  %v4364_v57 = vpop.f32.mrf.mxu3  ;;  %v3714_v26 = vld [vmem:[#allocation10 + $0x34] sm:$0xf]  ;;  %v3708_v4 = vld [vmem:[#allocation10 + $0x4] sm:$0xf] }
 0xb5c   :  { %v3004_v32 = vor.u32 %v3714_v26, %v3001_v28  ;;  %v2980_v22 = vor.u32 %v3708_v4, %v2977_v47  ;;  %v3325_v28 = vld [vmem:[#allocation10 + $0x2c4] sm:$0xf0]  ;;  %v3792_v4 = vld [vmem:[#allocation10 + $0x2a4] sm:$0xf]  ;;  %v3313_v47 = vld [vmem:[#allocation10 + $0x2ac] sm:$0xf0] }
 0xb5e   :  { %2261 = vmatpush.bf16.msrb.mxu2 %v3372_v42 }
 0xb5f   :  { %2297 = vmatpush.bf16.msrb.mxu1 %v3124_v43  ;;  %2284 = vmatpush.bf16.msra.mxu3 %v3028_v53  ;;  %v2989_v43 = vld [vmem:[#allocation10 + $0x24] sm:$0xf0]  ;;  %v3801_v53 = vld [vmem:[#allocation10 + $0x2ec] sm:$0xf] }
 0xb60   :  { %v2992_v44 = vor.u32 %v3711_v41, %v2989_v43  ;;  %v3352_v29 = vor.u32 %v3801_v53, %v3349_v18  ;;  %v3822_v43 = vld [vmem:[#allocation10 + $0x394] sm:$0xf]  ;;  %v3316_v53 = vor.u32 %v3792_v4, %v3313_v47  ;;  %v3819_v18 = vld [vmem:[#allocation10 + $0x37c] sm:$0xf]  ;;  %v3385_v4 = vld [vmem:[#allocation10 + $0x33c] sm:$0xf0] }
 0xb61   :  { %v3780_v47 = vld [vmem:[#allocation10 + $0x244] sm:$0xf] }
 0xb62   :  { %2262 = vmatpush.bf16.msrb.mxu2 %v3360_v46  ;;  %v3520_v46 = vor.u32 %v3843_v35, %v3517_v33  ;;  %v3783_v35 = vld [vmem:[#allocation10 + $0x25c] sm:$0xf]  ;;  %v3277_v33 = vld [vmem:[#allocation10 + $0x264] sm:$0xf0] }
 0xb63   :  { %2298 = vmatpush.bf16.msrb.mxu1 %v3112_v31  ;;  %v1034_v60 = vpop.f32.mrf.mxu3  ;;  %2285 = vmatpush.bf16.msra.mxu3 %v3016_v15  ;;  %v3846_v15 = vld [vmem:[#allocation10 + $0x454] sm:$0xf] }
 0xb64   :  { %v3541_v60 = vld [vmem:[#allocation10 + $0x474] sm:$0xf0]  ;;  %v3532_v27 = vor.u32 %v3846_v15, %v3529_v16 }
 0xb67   :  { %2299 = vmatpush.bf16.msrb.mxu1 %v3100_v6  ;;  %2286 = vmatpush.bf16.msra.mxu3 %v3004_v32 }
 0xb6b   :  { %2300 = vmatpush.bf16.msrb.mxu1 %v3088_v23  ;;  %2287 = vmatpush.bf16.msra.mxu3 %v2992_v44  ;;  %v3433_v44 = vld [vmem:[#allocation10 + $0x39c] sm:$0xf0] }
 0xb6f   :  { %2301 = vmatpush.bf16.msrb.mxu1 %v3076_v38  ;;  %2288 = vmatpush.bf16.msra.mxu3 %v2980_v22  ;;  %v3774_v38 = vld [vmem:[#allocation10 + $0x214] sm:$0xf] }
 0xbae   :  { %v1147_v31 = vpop.f32.mrf.mxu1 }
 0xbaf   :  { %v1148_v21 = vadd.f32 %v1147_v31, %v4362_v55  ;;  %v1173_v30 = vpop.f32.mrf.mxu0  ;;  %v3840_v31 = vld [vmem:[#allocation10 + $0x424] sm:$0xf] }
 0xbb0   :  { %v1174_v50 = vadd.f32 %v1173_v30, %v4364_v57  ;;  %v3544_v57 = vor.u32 %v3849_v56, %v3541_v60  ;;  %v3436_v30 = vor.u32 %v3822_v43, %v3433_v44  ;;  %v3762_v43 = vld [vmem:[#allocation10 + $0x1b4] sm:$0xf]  ;;  %v3193_v44 = vld [vmem:[#allocation10 + $0x1bc] sm:$0xf0] }
 0xbb1   :  { %v1218_v51 = vadd.f32 %v1206_v49, %v1148_v21  ;;  %v3244_v49 = vor.u32 %v3774_v38, %v3241_v39  ;;  %v3831_v38 = vld [vmem:[#allocation10 + $0x3dc] sm:$0xf]  ;;  %v3469_v39 = vld [vmem:[#allocation10 + $0x3e4] sm:$0xf0] }
 0xbb2   :  { %v1220_v10 = vadd.f32 %v1208_v5, %v1174_v50  ;;  %v3505_v5 = vld [vmem:[#allocation10 + $0x42c] sm:$0xf0]  ;;  %v3771_v50 = vld [vmem:[#allocation10 + $0x1fc] sm:$0xf] }
 0xbb3   :  { %v1224_v62 = vmax.f32 %v1218_v51, 0.0  ;;  %v3229_v51 = vld [vmem:[#allocation10 + $0x204] sm:$0xf0]  ;;  %v3508_v60 = vor.u32 %v3840_v31, %v3505_v5  ;;  %v3828_v31 = vld [vmem:[#allocation10 + $0x3c4] sm:$0xf] }
 0xbb4   :  { %v1226_v0 = vmax.f32 %v1220_v10, 0.0  ;;  %v1134_v1 = vpop.f32.mrf.mxu3  ;;  %v3421_v10 = vld [vmem:[#allocation10 + $0x384] sm:$0xf0]  ;;  %v3457_v5 = vld [vmem:[#allocation10 + $0x3cc] sm:$0xf0] }
 0xbb5   :  { %v4378_v3 = vpack.c.bf16 %v1224_v62, %v1224_v62  ;;  %v1135_v55 = vadd.f32 %v1134_v1, %v4358_v58  ;;  %v1160_v6 = vpop.f32.mrf.mxu2  ;;  %v3340_v58 = vor.u32 %v3798_v7, %v3337_v8  ;;  %v3789_v62 = vld [vmem:[#allocation10 + $0x28c] sm:$0xf] }
 0xbb6   :  { %v4381_v11 = vpack.c.bf16 %v1226_v0, %v1226_v0  ;;  %v1161_v13 = vadd.f32 %v1160_v6, %v4360_v52  ;;  %v1149_v14 = vpop.f32.mrf.mxu1  ;;  %v3795_v52 = vld [vmem:[#allocation10 + $0x2bc] sm:$0xf]  ;;  %v3232_v0 = vor.u32 %v3771_v50, %v3229_v51  ;;  %v3837_v1 = vld [vmem:[#allocation10 + $0x40c] sm:$0xf]  ;;  %v3768_v6 = vld [vmem:[#allocation10 + $0x1e4] sm:$0xf] }
 0xbb7   :  { %v1217_v17 = vadd.f32 %v1205_v63, %v1135_v55  ;;  %v1175_v12 = vpop.f32.mrf.mxu0  ;;  %2224 = vmatmul.bf16.vlgmr.msra.gmra.mxu0 %v4378_v3  ;;  %v3328_v42 = vor.u32 %v3795_v52, %v3325_v28  ;;  %v3301_v63 = vld [vmem:[#allocation10 + $0x294] sm:$0xf0]  ;;  %v3424_v55 = vor.u32 %v3819_v18, %v3421_v10  ;;  %v3409_v14 = vld [vmem:[#allocation10 + $0x36c] sm:$0xf0]  ;;  %v3755_v50 = vld [vmem:[#allocation10 + $0x178] sm:$0xf0] }
 0xbb8   :  { %v1219_v23 = vadd.f32 %v1207_v2, %v1161_v13  ;;  %2250 = vmatmul.bf16.vlgmr.msra.gmra.mxu1 %v4381_v11  ;;  %2320 = vmatpush.bf16.msra.mxu0 %v3352_v29  ;;  %v3493_v2 = vld [vmem:[#allocation10 + $0x414] sm:$0xf0]  ;;  %v3304_v8 = vor.u32 %v3789_v62, %v3301_v63  ;;  %v3816_v13 = vld [vmem:[#allocation10 + $0x364] sm:$0xf]  ;;  %v3786_v12 = vld [vmem:[#allocation10 + $0x274] sm:$0xf] }
 0xbb9   :  { %v1223_v26 = vmax.f32 %v1217_v17, 0.0  ;;  %2346 = vmatpush.bf16.msra.mxu1 %v3544_v57  ;;  %v3217_v57 = vld [vmem:[#allocation10 + $0x1ec] sm:$0xf0]  ;;  %v3496_v17 = vor.u32 %v3837_v1, %v3493_v2  ;;  %v3412_v25 = vor.u32 %v3816_v13, %v3409_v14  ;;  %v3292_v52 = vor.u32 %v3786_v12, %v3289_v19  ;;  %v3397_v28 = vld [vmem:[#allocation10 + $0x354] sm:$0xf0] }
 0xbba   :  { %v1225_v32 = vmax.f32 %v1219_v23, 0.0  ;;  %v3220_v23 = vor.u32 %v3768_v6, %v3217_v57  ;;  %v3355_v51 = vld [vmem:[#allocation10 + $0x2f0] sm:$0xf]  ;;  %v3803_v18 = vld [vmem:[#allocation10 + $0x2f8] sm:$0xf0] }
 0xbbb   :  { %v4386_v36 = vpack.c.bf16 %v1223_v26, %v1223_v26  ;;  %v3765_v26 = vld [vmem:[#allocation10 + $0x1cc] sm:$0xf]  ;;  %v3759_v10 = vld [vmem:[#allocation10 + $0x19c] sm:$0xf]  ;;  %v3373_v63 = vld [vmem:[#allocation10 + $0x324] sm:$0xf0] }
 0xbbc   :  { %v4388_v40 = vpack.c.bf16 %v1225_v32, %v1225_v32  ;;  %2321 = vmatpush.bf16.msra.mxu0 %v3340_v58  ;;  %v1136_v41 = vpop.f32.mrf.mxu3  ;;  %v3481_v58 = vld [vmem:[#allocation10 + $0x3fc] sm:$0xf0]  ;;  %v3807_v62 = vld [vmem:[#allocation10 + $0x31c] sm:$0xf]  ;;  %v3151_v2 = vld [vmem:[#allocation10 + $0x158] sm:$0xf] }
 0xbbd   :  { %2347 = vmatpush.bf16.msra.mxu1 %v3532_v27  ;;  %v1162_v54 = vpop.f32.mrf.mxu2  ;;  %2211 = vmatmul.bf16.vlgmr.msra.gmra.mxu2 %v4386_v36  ;;  %v3205_v27 = vld [vmem:[#allocation10 + $0x1d4] sm:$0xf0]  ;;  %v3800_v57 = vld [vmem:[#allocation10 + $0x2e0] sm:$0xf0]  ;;  %v3169_v13 = vld [vmem:[#allocation10 + $0x18c] sm:$0xf0] }
 0xbbe   :  { %2237 = vmatmul.bf16.vlgmr.msrb.gmra.mxu3 %v4388_v40  ;;  %2307 = vmatpush.bf16.msra.mxu2 %v3256_v34  ;;  %v1199_v22 = vpop.f32.mrf.mxu1  ;;  %v3343_v6 = vld [vmem:[#allocation10 + $0x2d8] sm:$0xf]  ;;  %v3804_v14 = vld [vmem:[#allocation10 + $0x304] sm:$0xf]  ;;  %v3731_v12 = vld [vmem:[#allocation10 + $0xb8] sm:$0xf0] }
 0xbbf   :  { %2333 = vmatpush.bf16.msrb.mxu3 %v3448_v37  ;;  %v1200_v21 = vadd.f32 %v1199_v22, %v4366_v59  ;;  %v1209_v59 = vperm.slane %v4370_v48, 4  ;;  %v3834_v48 = vld [vmem:[#allocation10 + $0x3f4] sm:$0xf]  ;;  %v3208_v37 = vor.u32 %v3765_v26, %v3205_v27  ;;  %v3472_v22 = vor.u32 %v3831_v38, %v3469_v39  ;;  %v3127_v39 = vld [vmem:[#allocation10 + $0x128] sm:$0xf] }
 0xbc0   :  { %2322 = vmatpush.bf16.msra.mxu0 %v3328_v42  ;;  %v3484_v34 = vor.u32 %v3834_v48, %v3481_v58  ;;  %v3344_v48 = vor.u32 %v3800_v57, %v3343_v6  ;;  %v3019_v6 = vld [vmem:[#allocation10 + $0x50] sm:$0xf]  ;;  %v3719_v57 = vld [vmem:[#allocation10 + $0x58] sm:$0xf0] }
 0xbc1   :  { %v1222_v56 = vadd.f32 %v1210_v45, %v1200_v21  ;;  %2348 = vmatpush.bf16.msra.mxu1 %v3520_v46  ;;  %v3280_v45 = vor.u32 %v3783_v35, %v3277_v33  ;;  %v3810_v46 = vld [vmem:[#allocation10 + $0x334] sm:$0xf]  ;;  %v3196_v21 = vor.u32 %v3762_v43, %v3193_v44  ;;  %v3247_v33 = vld [vmem:[#allocation10 + $0x218] sm:$0xf]  ;;  %v3319_v44 = vld [vmem:[#allocation10 + $0x2a8] sm:$0xf] }
 0xbc2   :  { %2308 = vmatpush.bf16.msra.mxu2 %v3244_v49  ;;  %v3265_v49 = vld [vmem:[#allocation10 + $0x24c] sm:$0xf0] }
 0xbc3   :  { %v1228_v29 = vmax.f32 %v1222_v56, 0.0  ;;  %2334 = vmatpush.bf16.msrb.mxu3 %v3436_v30  ;;  %v3163_v30 = vld [vmem:[#allocation10 + $0x170] sm:$0xf]  ;;  %v3181_v56 = vld [vmem:[#allocation10 + $0x1a4] sm:$0xf0] }
 0xbc4   :  { %2323 = vmatpush.bf16.msra.mxu0 %v3316_v53  ;;  %v1186_v7 = vpop.f32.mrf.mxu3  ;;  %v3388_v53 = vor.u32 %v3810_v46, %v3385_v4  ;;  %v3164_v1 = vor.u32 %v3755_v50, %v3163_v30  ;;  %v3043_v46 = vld [vmem:[#allocation10 + $0x80] sm:$0xf]  ;;  %v3725_v4 = vld [vmem:[#allocation10 + $0x88] sm:$0xf0]  ;;  %v3307_v50 = vld [vmem:[#allocation10 + $0x290] sm:$0xf] }
 0xbc5   :  { %v4395_v15 = vpack.c.bf16 %v1228_v29, %v1228_v29  ;;  %2349 = vmatpush.bf16.msra.mxu1 %v3508_v60  ;;  %v1187_v16 = vadd.f32 %v1186_v7, %v4368_v61  ;;  %v3813_v61 = vld [vmem:[#allocation10 + $0x34c] sm:$0xf]  ;;  %v3268_v60 = vor.u32 %v3780_v47, %v3265_v49  ;;  %v3356_v29 = vor.u32 %v3803_v18, %v3355_v51  ;;  %v3791_v51 = vld [vmem:[#allocation10 + $0x298] sm:$0xf0]  ;;  %v3031_v18 = vld [vmem:[#allocation10 + $0x68] sm:$0xf] }
 0xbc6   :  { %2309 = vmatpush.bf16.msra.mxu2 %v3232_v0  ;;  %v1201_v20 = vpop.f32.mrf.mxu1  ;;  %v3400_v42 = vor.u32 %v3813_v61, %v3397_v28  ;;  %v3460_v0 = vor.u32 %v3828_v31, %v3457_v5  ;;  %v3376_v7 = vor.u32 %v3807_v62, %v3373_v63  ;;  %v3797_v61 = vld [vmem:[#allocation10 + $0x2c8] sm:$0xf0]  ;;  %v3115_v5 = vld [vmem:[#allocation10 + $0x110] sm:$0xf]  ;;  %v3044_v30 = vor.u32 %v3725_v4, %v3043_v46  ;;  %v3770_v62 = vld [vmem:[#allocation10 + $0x1f0] sm:$0xf0] }
 0xbc7   :  { %v1221_v24 = vadd.f32 %v1209_v59, %v1187_v16  ;;  %2335 = vmatpush.bf16.msrb.mxu3 %v3424_v55  ;;  %2276 = vmatmul.bf16.vlgmr.msrb.gmra.mxu0 %v4395_v15  ;;  %v3184_v59 = vor.u32 %v3759_v10, %v3181_v56  ;;  %v3752_v55 = vld [vmem:[#allocation10 + $0x160] sm:$0xf0]  ;;  %v3361_v16 = vld [vmem:[#allocation10 + $0x30c] sm:$0xf0]  ;;  %v3773_v49 = vld [vmem:[#allocation10 + $0x208] sm:$0xf0]  ;;  %v3308_v63 = vor.u32 %v3791_v51, %v3307_v50 }
 0xbc8   :  { %2302 = vmatmul.bf16.vlgmr.msrb.gmra.mxu1 %v4378_v3  ;;  %2324 = vmatpush.bf16.msra.mxu0 %v3304_v8  ;;  %v3756_v8 = vld [vmem:[#allocation10 + $0x184] sm:$0xf]  ;;  %v3152_v19 = vor.u32 %v3752_v55, %v3151_v2  ;;  %v3259_v20 = vld [vmem:[#allocation10 + $0x230] sm:$0xf]  ;;  %v3364_v26 = vor.u32 %v3804_v14, %v3361_v16  ;;  %v3722_v10 = vld [vmem:[#allocation10 + $0x70] sm:$0xf0] }
 0xbc9   :  { %v1227_v32 = vmax.f32 %v1221_v24, 0.0  ;;  %2350 = vmatpush.bf16.msra.mxu1 %v3496_v17  ;;  %v3067_v17 = vld [vmem:[#allocation10 + $0xb0] sm:$0xf]  ;;  %v3172_v58 = vor.u32 %v3756_v8, %v3169_v13  ;;  %v3139_v24 = vld [vmem:[#allocation10 + $0x140] sm:$0xf]  ;;  %v3032_v2 = vor.u32 %v3722_v10, %v3031_v18 }
 0xbca   :  { %2310 = vmatpush.bf16.msra.mxu2 %v3220_v23  ;;  %v3779_v23 = vld [vmem:[#allocation10 + $0x238] sm:$0xf0]  ;;  %v3068_v27 = vor.u32 %v3731_v12, %v3067_v17  ;;  %v3211_v8 = vld [vmem:[#allocation10 + $0x1d0] sm:$0xf]  ;;  %v3091_v16 = vld [vmem:[#allocation10 + $0xe0] sm:$0xf]  ;;  %v3020_v12 = vor.u32 %v3719_v57, %v3019_v6 }
 0xbcb   :  { %v4400_v41 = vpack.c.bf16 %v1227_v32, %v1227_v32  ;;  %2336 = vmatpush.bf16.msrb.mxu3 %v3412_v25  ;;  %v3749_v25 = vld [vmem:[#allocation10 + $0x148] sm:$0xf0]  ;;  %v3260_v28 = vor.u32 %v3779_v23, %v3259_v20  ;;  %v3055_v32 = vld [vmem:[#allocation10 + $0x98] sm:$0xf]  ;;  %v3767_v13 = vld [vmem:[#allocation10 + $0x1d8] sm:$0xf0] }
 0xbcc   :  { %2325 = vmatpush.bf16.msra.mxu0 %v3292_v52  ;;  %v1188_v54 = vpop.f32.mrf.mxu3  ;;  %v3331_v52 = vld [vmem:[#allocation10 + $0x2c0] sm:$0xf]  ;;  %v3140_v35 = vor.u32 %v3749_v25, %v3139_v24  ;;  %v3737_v17 = vld [vmem:[#allocation10 + $0xe8] sm:$0xf0]  ;;  %v3212_v23 = vor.u32 %v3767_v13, %v3211_v8  ;;  %v3199_v25 = vld [vmem:[#allocation10 + $0x1b8] sm:$0xf] }
 0xbcd   :  { %2351 = vmatpush.bf16.msra.mxu1 %v3484_v34  ;;  %2263 = vmatmul.bf16.vlgmr.msrb.gmra.mxu2 %v4400_v41  ;;  %v3728_v34 = vld [vmem:[#allocation10 + $0xa0] sm:$0xf0]  ;;  %v3332_v38 = vor.u32 %v3797_v61, %v3331_v52  ;;  %v3794_v54 = vld [vmem:[#allocation10 + $0x2b0] sm:$0xf0]  ;;  %v3785_v20 = vld [vmem:[#allocation10 + $0x268] sm:$0xf0]  ;;  %v3092_v24 = vor.u32 %v3737_v17, %v3091_v16 }
 0xbce   :  { %2289 = vmatmul.bf16.vlgmr.msra.gmra.mxu3 %v4386_v36  ;;  %2311 = vmatpush.bf16.msra.mxu2 %v3208_v37  ;;  %v3776_v37 = vld [vmem:[#allocation10 + $0x220] sm:$0xf0]  ;;  %v3056_v43 = vor.u32 %v3728_v34, %v3055_v32  ;;  %v3320_v31 = vor.u32 %v3794_v54, %v3319_v44  ;;  %v3079_v52 = vld [vmem:[#allocation10 + $0xc8] sm:$0xf]  ;;  %v3734_v61 = vld [vmem:[#allocation10 + $0xd0] sm:$0xf0] }
 0xbcf   :  { %2337 = vmatpush.bf16.msrb.mxu3 %v3400_v42  ;;  %v3746_v42 = vld [vmem:[#allocation10 + $0x130] sm:$0xf0]  ;;  %v3761_v44 = vld [vmem:[#allocation10 + $0x1a8] sm:$0xf0]  ;;  %v3535_v4 = vld [vmem:[#allocation10 + $0x458] sm:$0xf] }
 0xbd0   :  { %2326 = vmatpush.bf16.msra.mxu0 %v3280_v45  ;;  %v3248_v45 = vor.u32 %v3776_v37, %v3247_v33  ;;  %v3128_v47 = vor.u32 %v3746_v42, %v3127_v39  ;;  %v3782_v34 = vld [vmem:[#allocation10 + $0x250] sm:$0xf0]  ;;  %v3851_v33 = vld [vmem:[#allocation10 + $0x478] sm:$0xf0]  ;;  %v3713_v39 = vld [vmem:[#allocation10 + $0x28] sm:$0xf0]  ;;  %v3080_v42 = vor.u32 %v3734_v61, %v3079_v52 }
 0xbd1   :  { %2352 = vmatpush.bf16.msra.mxu1 %v3472_v22  ;;  %v3235_v22 = vld [vmem:[#allocation10 + $0x200] sm:$0xf]  ;;  %v3827_v50 = vld [vmem:[#allocation10 + $0x3b8] sm:$0xf0]  ;;  %v3845_v10 = vld [vmem:[#allocation10 + $0x448] sm:$0xf0] }
 0xbd2   :  { %2312 = vmatpush.bf16.msra.mxu2 %v3196_v21  ;;  %v3743_v21 = vld [vmem:[#allocation10 + $0x118] sm:$0xf0]  ;;  %v3523_v18 = vld [vmem:[#allocation10 + $0x440] sm:$0xf]  ;;  %v3499_v6 = vld [vmem:[#allocation10 + $0x410] sm:$0xf] }
 0xbd3   :  { %2338 = vmatpush.bf16.msrb.mxu3 %v3388_v53  ;;  %v3236_v53 = vor.u32 %v3773_v49, %v3235_v22  ;;  %v3116_v56 = vor.u32 %v3743_v21, %v3115_v5  ;;  %v2983_v49 = vld [vmem:[#allocation10 + $0x8] sm:$0xf]  ;;  %v3758_v21 = vld [vmem:[#allocation10 + $0x190] sm:$0xf0]  ;;  %v3836_v16 = vld [vmem:[#allocation10 + $0x400] sm:$0xf0] }
 0xbd4   :  { %2327 = vmatpush.bf16.msra.mxu0 %v3268_v60  ;;  %v3223_v60 = vld [vmem:[#allocation10 + $0x1e8] sm:$0xf]  ;;  %v3818_v8 = vld [vmem:[#allocation10 + $0x370] sm:$0xf0]  ;;  %v3379_v52 = vld [vmem:[#allocation10 + $0x320] sm:$0xf] }
 0xbd5   :  { %2353 = vmatpush.bf16.msra.mxu1 %v3460_v0  ;;  %v3103_v0 = vld [vmem:[#allocation10 + $0xf8] sm:$0xf]  ;;  %v3224_v55 = vor.u32 %v3770_v62, %v3223_v60  ;;  %v3175_v5 = vld [vmem:[#allocation10 + $0x188] sm:$0xf]  ;;  %v3809_v61 = vld [vmem:[#allocation10 + $0x328] sm:$0xf0] }
 0xbd6   :  { %2313 = vmatpush.bf16.msra.mxu2 %v3184_v59  ;;  %v3788_v59 = vld [vmem:[#allocation10 + $0x280] sm:$0xf0]  ;;  %v3439_v62 = vld [vmem:[#allocation10 + $0x398] sm:$0xf] }
 0xbd7   :  { %2339 = vmatpush.bf16.msrb.mxu3 %v3376_v7  ;;  %2328 = vmatmul.bf16.vlgmr.msra.gmra.mxu0 %v4381_v11 }
 0xbd8   :  { %2372 = vmatpush.bf16.msrb.mxu0 %v3164_v1  ;;  %2354 = vmatmul.bf16.vlgmr.msra.gmra.mxu1 %v4395_v15  ;;  %v3740_v1 = vld [vmem:[#allocation10 + $0x100] sm:$0xf0] }
 0xbd9   :  { %2398 = vmatpush.bf16.msrb.mxu1 %v3356_v29  ;;  %v3295_v29 = vld [vmem:[#allocation10 + $0x278] sm:$0xf]  ;;  %v3104_v7 = vor.u32 %v3740_v1, %v3103_v0  ;;  %v3524_v0 = vor.u32 %v3845_v10, %v3523_v18  ;;  %v3511_v1 = vld [vmem:[#allocation10 + $0x428] sm:$0xf] }
 0xbda   :  { %2314 = vmatpush.bf16.msra.mxu2 %v3172_v58  ;;  %v3296_v14 = vor.u32 %v3788_v59, %v3295_v29  ;;  %v3716_v58 = vld [vmem:[#allocation10 + $0x40] sm:$0xf0]  ;;  %v3427_v59 = vld [vmem:[#allocation10 + $0x380] sm:$0xf] }
 0xbdb   :  { %2340 = vmatpush.bf16.msrb.mxu3 %v3364_v26  ;;  %v3764_v26 = vld [vmem:[#allocation10 + $0x1c0] sm:$0xf0] }
 0xbdc   :  { %2373 = vmatpush.bf16.msrb.mxu0 %v3152_v19  ;;  %v3283_v19 = vld [vmem:[#allocation10 + $0x260] sm:$0xf]  ;;  %v3200_v37 = vor.u32 %v3764_v26, %v3199_v25  ;;  %v3463_v25 = vld [vmem:[#allocation10 + $0x3c8] sm:$0xf]  ;;  %v3830_v26 = vld [vmem:[#allocation10 + $0x3d0] sm:$0xf0] }
 0xbdd   :  { %2399 = vmatpush.bf16.msrb.mxu1 %v3344_v48  ;;  %2315 = vmatmul.bf16.vlgmr.msra.gmra.mxu2 %v4388_v40  ;;  %v3007_v48 = vld [vmem:[#allocation10 + $0x38] sm:$0xf] }
 0xbde   :  { %2359 = vmatpush.bf16.msrb.mxu2 %v3068_v27  ;;  %2341 = vmatmul.bf16.vlgmr.msrb.gmra.mxu3 %v4400_v41  ;;  %v3284_v27 = vor.u32 %v3785_v20, %v3283_v19  ;;  %v3008_v32 = vor.u32 %v3716_v58, %v3007_v48  ;;  %v3815_v19 = vld [vmem:[#allocation10 + $0x358] sm:$0xf0]  ;;  %v3475_v20 = vld [vmem:[#allocation10 + $0x3e0] sm:$0xf]  ;;  %v3391_v48 = vld [vmem:[#allocation10 + $0x338] sm:$0xf] }
 0xbdf   :  { %2385 = vmatpush.bf16.msra.mxu3 %v3260_v28  ;;  %v3271_v28 = vld [vmem:[#allocation10 + $0x248] sm:$0xf]  ;;  %v3812_v58 = vld [vmem:[#allocation10 + $0x340] sm:$0xf0] }
 0xbe0   :  { %2374 = vmatpush.bf16.msrb.mxu0 %v3140_v35  ;;  %v3547_v35 = vld [vmem:[#allocation10 + $0x470] sm:$0xf]  ;;  %v3272_v54 = vor.u32 %v3782_v34, %v3271_v28  ;;  %v3464_v28 = vor.u32 %v3830_v26, %v3463_v25  ;;  %v3367_v34 = vld [vmem:[#allocation10 + $0x308] sm:$0xf] }
 0xbe1   :  { %2400 = vmatpush.bf16.msrb.mxu1 %v3332_v38  ;;  %v2995_v38 = vld [vmem:[#allocation10 + $0x20] sm:$0xf] }
 0xbe2   :  { %2360 = vmatpush.bf16.msrb.mxu2 %v3056_v43  ;;  %v3187_v43 = vld [vmem:[#allocation10 + $0x1a0] sm:$0xf]  ;;  %v2996_v46 = vor.u32 %v3713_v39, %v2995_v38  ;;  %v3858_v38 = vld [vmem:[#allocation5 + $0xc8] sm:$0xff]  ;;  %v3857_v39 = vld [vmem:[#allocation5 + $0xc0] sm:$0xff] }
 0xbe3   :  { %2386 = vmatpush.bf16.msra.mxu3 %v3248_v45  ;;  %v3548_v45 = vor.u32 %v3851_v33, %v3547_v35  ;;  %v3188_v22 = vor.u32 %v3761_v44, %v3187_v43  ;;  %v3806_v35 = vld [vmem:[#allocation10 + $0x310] sm:$0xf0]  ;;  %v3855_v43 = vld [vmem:[#allocation5 + $0xb0] sm:$0xff]  ;;  %v3854_v44 = vld [vmem:[#allocation5 + $0xa8] sm:$0xff] }
 0xbe4   :  { %2375 = vmatpush.bf16.msrb.mxu0 %v3128_v47  ;;  %v3848_v47 = vld [vmem:[#allocation10 + $0x460] sm:$0xf0]  ;;  %v3368_v33 = vor.u32 %v3806_v35, %v3367_v34 }
 0xbe5   :  { %2401 = vmatpush.bf16.msrb.mxu1 %v3320_v31  ;;  %v3710_v31 = vld [vmem:[#allocation10 + $0x10] sm:$0xf0]  ;;  %v3536_v51 = vor.u32 %v3848_v47, %v3535_v4 }
 0xbe6   :  { %2361 = vmatpush.bf16.msrb.mxu2 %v3044_v30  ;;  %v3451_v30 = vld [vmem:[#allocation10 + $0x3b0] sm:$0xf] }
 0xbe7   :  { %2387 = vmatpush.bf16.msra.mxu3 %v3236_v53  ;;  %v2984_v53 = vor.u32 %v3710_v31, %v2983_v49  ;;  %v3452_v60 = vor.u32 %v3827_v50, %v3451_v30  ;;  %v3865_v47 = vld [vmem:[#allocation5 + $0x100] sm:$0xff]  ;;  %v4414_v31 = vld [vmem:[#allocation2 + $0x12] sm:$0x7] }
 0xbe8   :  { %2376 = vmatpush.bf16.msrb.mxu0 %v3116_v56  ;;  %v3176_v56 = vor.u32 %v3758_v21, %v3175_v5  ;;  %v3863_v21 = vld [vmem:[#allocation5 + $0xf0] sm:$0xff]  ;;  %v1429_v30 = vperm.slane %v4414_v31, 0 }
 0xbe9   :  { %2402 = vmatpush.bf16.msrb.mxu1 %v3308_v63  ;;  %v3824_v63 = vld [vmem:[#allocation10 + $0x3a0] sm:$0xf0] }
 0xbea   :  { %2362 = vmatpush.bf16.msrb.mxu2 %v3032_v2  ;;  %v3842_v2 = vld [vmem:[#allocation10 + $0x430] sm:$0xf0]  ;;  %v3440_v29 = vor.u32 %v3824_v63, %v3439_v62 }
 0xbeb   :  { %2388 = vmatpush.bf16.msra.mxu3 %v3224_v55  ;;  %v3821_v55 = vld [vmem:[#allocation10 + $0x388] sm:$0xf0] }
 0xbec   :  { %2377 = vmatpush.bf16.msrb.mxu0 %v3104_v7  ;;  %v3428_v57 = vor.u32 %v3821_v55, %v3427_v59  ;;  %v3415_v7 = vld [vmem:[#allocation10 + $0x368] sm:$0xf] }
 0xbed   :  { %2403 = vmatpush.bf16.msrb.mxu1 %v3296_v14  ;;  %v3487_v14 = vld [vmem:[#allocation10 + $0x3f8] sm:$0xf]  ;;  %v3416_v17 = vor.u32 %v3818_v8, %v3415_v7 }
 0xbee   :  { %2363 = vmatpush.bf16.msrb.mxu2 %v3020_v12  ;;  %v3403_v12 = vld [vmem:[#allocation10 + $0x350] sm:$0xf] }
 0xbef   :  { %2389 = vmatpush.bf16.msra.mxu3 %v3212_v23  ;;  %v3833_v23 = vld [vmem:[#allocation10 + $0x3e8] sm:$0xf0] }
 0xbf0   :  { %2378 = vmatpush.bf16.msrb.mxu0 %v3092_v24  ;;  %v3476_v24 = vor.u32 %v3833_v23, %v3475_v20 }
 0xbf1   :  { %2404 = vmatpush.bf16.msrb.mxu1 %v3284_v27  ;;  %v3392_v27 = vor.u32 %v3812_v58, %v3391_v48 }
 0xbf2   :  { %2364 = vmatpush.bf16.msrb.mxu2 %v3008_v32  ;;  %v3380_v32 = vor.u32 %v3809_v61, %v3379_v52 }
 0xbf3   :  { %2390 = vmatpush.bf16.msra.mxu3 %v3200_v37  ;;  %v3859_v37 = vld [vmem:[#allocation5 + $0xd0] sm:$0xff] }
 0xbf4   :  { %2379 = vmatpush.bf16.msrb.mxu0 %v3080_v42  ;;  %v3856_v42 = vld [vmem:[#allocation5 + $0xb8] sm:$0xff] }
 0xbf5   :  { %2405 = vmatpush.bf16.msrb.mxu1 %v3272_v54  ;;  %v3867_v54 = vld [vmem:[#allocation5 + $0x110] sm:$0xff] }
 0xbf6   :  { %2365 = vmatpush.bf16.msrb.mxu2 %v2996_v46  ;;  %v3866_v46 = vld [vmem:[#allocation5 + $0x108] sm:$0xff] }
 0xbf7   :  { %2391 = vmatpush.bf16.msra.mxu3 %v3188_v22  ;;  %2380 = vmatmul.bf16.vlgmr.msrb.gmra.mxu0 %v4378_v3  ;;  %v3512_v3 = vor.u32 %v3842_v2, %v3511_v1  ;;  %v3864_v22 = vld [vmem:[#allocation5 + $0xf8] sm:$0xff] }
 0xbf8   :  { %2424 = vmatpush.bf16.msra.mxu0 %v3548_v45  ;;  %2406 = vmatmul.bf16.vlgmr.msrb.gmra.mxu1 %v4381_v11  ;;  %v3839_v11 = vld [vmem:[#allocation10 + $0x418] sm:$0xf0]  ;;  %v3853_v45 = vld [vmem:[#allocation5 + $0xa0] sm:$0xff]  ;;  %v3860_v1 = vld [vmem:[#allocation5 + $0xd8] sm:$0xff] }
 0xbf9   :  { %v3500_v13 = vor.u32 %v3839_v11, %v3499_v6  ;;  %2652 = vmatpush.bf16.msra.mxu1 %v3867_v54  ;;  %v3869_v54 = vld [vmem:[#allocation5 + $0x120] sm:$0xff] }
 0xbfa   :  { %2366 = vmatpush.bf16.msrb.mxu2 %v2984_v53  ;;  %v3862_v53 = vld [vmem:[#allocation5 + $0xe8] sm:$0xff] }
 0xbfb   :  { %2392 = vmatpush.bf16.msra.mxu3 %v3176_v56 }
 0xbfc   :  { %2425 = vmatpush.bf16.msra.mxu0 %v3536_v51 }
 0xbfd   :  { %2367 = vmatmul.bf16.vlgmr.msrb.gmra.mxu2 %v4386_v36  ;;  %v3488_v36 = vor.u32 %v3836_v16, %v3487_v14  ;;  %2653 = vmatpush.bf16.msra.mxu1 %v3866_v46  ;;  %v1430_v16 = vperm.slane %v4414_v31, 1 }
 0xbfe   :  { %2411 = vmatpush.bf16.msra.mxu2 %v3452_v60  ;;  %2393 = vmatmul.bf16.vlgmr.msra.gmra.mxu3 %v4388_v40  ;;  %v3404_v40 = vor.u32 %v3815_v19, %v3403_v12  ;;  %v3861_v60 = vld [vmem:[#allocation5 + $0xe0] sm:$0xff] }
 0xbff   :  { %2639 = vmatpush.bf16.msrb.mxu3 %v3859_v37  ;;  %v3871_v37 = vld [vmem:[#allocation5 + $0x130] sm:$0xff] }
 0xc00   :  { %2426 = vmatpush.bf16.msra.mxu0 %v3524_v0 }
 0xc01   :  { %2654 = vmatpush.bf16.msra.mxu1 %v3865_v47  ;;  %v1431_v47 = vperm.slane %v4414_v31, 2  ;;  %v3880_v31 = vld [vmem:[#allocation5 + $0x178] sm:$0xff] }
 0xc02   :  { %2412 = vmatpush.bf16.msra.mxu2 %v3440_v29 }
 0xc03   :  { %2640 = vmatpush.bf16.msrb.mxu3 %v3858_v38 }
 0xc04   :  { %2427 = vmatpush.bf16.msra.mxu0 %v3512_v3 }
 0xc05   :  { %2655 = vmatpush.bf16.msra.mxu1 %v3864_v22 }
 0xc06   :  { %2413 = vmatpush.bf16.msra.mxu2 %v3428_v57 }
 0xc07   :  { %2641 = vmatpush.bf16.msrb.mxu3 %v3857_v39 }
 0xc08   :  { %2428 = vmatpush.bf16.msra.mxu0 %v3500_v13 }
 0xc09   :  { %2656 = vmatpush.bf16.msra.mxu1 %v3863_v21 }
 0xc0a   :  { %2414 = vmatpush.bf16.msra.mxu2 %v3416_v17 }
 0xc0b   :  { %2642 = vmatpush.bf16.msrb.mxu3 %v3856_v42  ;;  %v3870_v42 = vld [vmem:[#allocation5 + $0x128] sm:$0xff] }
 0xc0c   :  { %2429 = vmatpush.bf16.msra.mxu0 %v3488_v36 }
 0xc0d   :  { %2657 = vmatpush.bf16.msra.mxu1 %v3862_v53 }
 0xc0e   :  { %2415 = vmatpush.bf16.msra.mxu2 %v3404_v40 }
 0xc0f   :  { %2643 = vmatpush.bf16.msrb.mxu3 %v3855_v43 }
 0xc10   :  { %2430 = vmatpush.bf16.msra.mxu0 %v3476_v24  ;;  %v3875_v24 = vld [vmem:[#allocation5 + $0x150] sm:$0xff] }
 0xc11   :  { %2658 = vmatpush.bf16.msra.mxu1 %v3861_v60 }
 0xc12   :  { %2416 = vmatpush.bf16.msra.mxu2 %v3392_v27  ;;  %v3874_v27 = vld [vmem:[#allocation5 + $0x148] sm:$0xff] }
 0xc13   :  { %2644 = vmatpush.bf16.msrb.mxu3 %v3854_v44 }
 0xc14   :  { %2431 = vmatpush.bf16.msra.mxu0 %v3464_v28  ;;  %v3873_v28 = vld [vmem:[#allocation5 + $0x140] sm:$0xff] }
 0xc15   :  { %2659 = vmatpush.bf16.msra.mxu1 %v3860_v1 }
 0xc16   :  { %2417 = vmatpush.bf16.msra.mxu2 %v3380_v32 }
 0xc17   :  { %2432 = vmatmul.bf16.vlgmr.msra.gmra.mxu0 %v4395_v15  ;;  %2645 = vmatpush.bf16.msrb.mxu3 %v3853_v45 }
 0xc1a   :  { %2418 = vmatpush.bf16.msra.mxu2 %v3368_v33  ;;  %v3872_v33 = vld [vmem:[#allocation5 + $0x138] sm:$0xff] }
 0xc1d   :  { %2419 = vmatmul.bf16.vlgmr.msra.gmra.mxu2 %v4400_v41  ;;  %v3852_v41 = vld [vmem:[#allocation5 + $0x98] sm:$0xff] }
 0xc1e   :  { %2646 = vmatpush.bf16.msrb.mxu3 %v3852_v41  ;;  %2665 = vmatpush.bf16.msrb.mxu2 %v3875_v24 }
 0xc22   :  { %2666 = vmatpush.bf16.msrb.mxu2 %v3874_v27 }
 0xc26   :  { %2667 = vmatpush.bf16.msrb.mxu2 %v3873_v28 }
 0xc2a   :  { %2668 = vmatpush.bf16.msrb.mxu2 %v3872_v33 }
 0xc2e   :  { %2669 = vmatpush.bf16.msrb.mxu2 %v3871_v37 }
 0xc32   :  { %2670 = vmatpush.bf16.msrb.mxu2 %v3870_v42 }
 0xc34   :  { %v2225_v15 = vpop.f32.mrf.mxu0 }
 0xc35   :  { %v2251_v4 = vpop.f32.mrf.mxu1 }
 0xc36   :  { %2671 = vmatpush.bf16.msrb.mxu2 %v3869_v54 }
 0xc3c   :  { %v2227_v49 = vpop.f32.mrf.mxu0 }
 0xc3d   :  { %v2253_v5 = vpop.f32.mrf.mxu1 }
 0xc40   :  { %v2212_v50 = vpop.f32.mrf.mxu2 }
 0xc41   :  { %v2238_v51 = vpop.f32.mrf.mxu3  ;;  %v2213_v18 = vadd.f32 %v2212_v50, %v1429_v30 }
 0xc43   :  { %v2226_v62 = vadd.f32 %v2225_v15, %v2213_v18  ;;  %v3868_v15 = vld [vmem:[#allocation5 + $0x118] sm:$0xff] }
 0xc44   :  { %v2277_v10 = vpop.f32.mrf.mxu0  ;;  %2672 = vmatpush.bf16.msrb.mxu2 %v3868_v15 }
 0xc45   :  { %v2303_v56 = vpop.f32.mrf.mxu1  ;;  %v2239_v2 = vadd.f32 %v2238_v51, %v2226_v62  ;;  %v3883_v62 = vld [vmem:[#allocation5 + $0x190] sm:$0xff] }
 0xc46   :  { %2748 = vmatpush.bf16.msrb.mxu0 %v3883_v62 }
 0xc47   :  { %v2252_v55 = vadd.f32 %v2251_v4, %v2239_v2  ;;  %v3879_v2 = vld [vmem:[#allocation5 + $0x170] sm:$0xff] }
 0xc48   :  { %v2214_v63 = vpop.f32.mrf.mxu2 }
 0xc49   :  { %v2240_v0 = vpop.f32.mrf.mxu3  ;;  %v3882_v63 = vld [vmem:[#allocation5 + $0x188] sm:$0xff] }
 0xc4a   :  { %2749 = vmatpush.bf16.msrb.mxu0 %v3882_v63  ;;  %v3881_v0 = vld [vmem:[#allocation5 + $0x180] sm:$0xff] }
 0xc4c   :  { %v2279_v29 = vpop.f32.mrf.mxu0 }
 0xc4d   :  { %v2305_v59 = vpop.f32.mrf.mxu1 }
 0xc4e   :  { %2750 = vmatpush.bf16.msrb.mxu0 %v3881_v0  ;;  %v3878_v59 = vld [vmem:[#allocation5 + $0x168] sm:$0xff] }
 0xc50   :  { %v2264_v3 = vpop.f32.mrf.mxu2 }
 0xc51   :  { %v2265_v6 = vadd.f32 %v2264_v3, %v2252_v55  ;;  %v2290_v11 = vpop.f32.mrf.mxu3 }
 0xc52   :  { %v2291_v19 = vadd.f32 %v2290_v11, %v1430_v16  ;;  %2751 = vmatpush.bf16.msrb.mxu0 %v3880_v31  ;;  %v3876_v11 = vld [vmem:[#allocation5 + $0x158] sm:$0xff] }
 0xc53   :  { %v2278_v57 = vadd.f32 %v2277_v10, %v2265_v6  ;;  %v3877_v6 = vld [vmem:[#allocation5 + $0x160] sm:$0xff] }
 0xc54   :  { %v2329_v7 = vpop.f32.mrf.mxu0  ;;  %v2304_v23 = vadd.f32 %v2303_v56, %v2291_v19  ;;  %v3929_v19 = vld [vmem:[#allocation2 + $0x16] ss:$0 sm:$0xff] }
 0xc55   :  { %v2437_v8 = vmax.f32 %v2278_v57, 0.0  ;;  %v2355_v13 = vpop.f32.mrf.mxu1  ;;  %v3928_v57 = vld [vmem:[#allocation2 + $0x15] ss:$0 sm:$0xff] }
 0xc56   :  { %2752 = vmatpush.bf16.msrb.mxu0 %v3879_v2 }
 0xc57   :  { %v2440_v14 = vpack.c.bf16 %v2437_v8, %v2437_v8 }
 0xc58   :  { %v2266_v17 = vpop.f32.mrf.mxu2 }
 0xc59   :  { %v2292_v12 = vpop.f32.mrf.mxu3  ;;  %2647 = vmatmul.bf16.vlgmr.msrb.gmra.mxu3 %v2440_v14 }
 0xc5a   :  { %2753 = vmatpush.bf16.msrb.mxu0 %v3878_v59 }
 0xc5c   :  { %v2331_v36 = vpop.f32.mrf.mxu0 }
 0xc5d   :  { %v2357_v20 = vpop.f32.mrf.mxu1 }
 0xc5e   :  { %2754 = vmatpush.bf16.msrb.mxu0 %v3877_v6 }
 0xc60   :  { %v2316_v40 = vpop.f32.mrf.mxu2 }
 0xc61   :  { %v2317_v48 = vadd.f32 %v2316_v40, %v2304_v23  ;;  %v2342_v58 = vpop.f32.mrf.mxu3  ;;  %v3930_v23 = vld [vmem:[#allocation2 + $0x18] ss:$0 sm:$0xff] }
 0xc62   :  { %2755 = vmatpush.bf16.msrb.mxu0 %v3876_v11 }
 0xc63   :  { %v2330_v25 = vadd.f32 %v2329_v7, %v2317_v48 }
 0xc65   :  { %v2343_v26 = vadd.f32 %v2342_v58, %v2330_v25  ;;  %v3931_v25 = vld [vmem:[#allocation2 + $0x17] ss:$0 sm:$0xff] }
 0xc67   :  { %v2356_v52 = vadd.f32 %v2355_v13, %v2343_v26 }
 0xc68   :  { %v2318_v61 = vpop.f32.mrf.mxu2 }
 0xc69   :  { %v2438_v32 = vmax.f32 %v2356_v52, 0.0  ;;  %v2344_v34 = vpop.f32.mrf.mxu3 }
 0xc6b   :  { %v2441_v35 = vpack.c.bf16 %v2438_v32, %v2438_v32 }
 0xc6d   :  { %2660 = vmatmul.bf16.vlgmr.msra.gmra.mxu1 %v2441_v35 }
 0xc74   :  { %v2381_v38 = vpop.f32.mrf.mxu0 }
 0xc75   :  { %v2407_v39 = vpop.f32.mrf.mxu1 }
 0xc7c   :  { %v2383_v43 = vpop.f32.mrf.mxu0 }
 0xc7d   :  { %v2409_v44 = vpop.f32.mrf.mxu1 }
 0xc80   :  { %v2368_v45 = vpop.f32.mrf.mxu2 }
 0xc81   :  { %v2394_v46 = vpop.f32.mrf.mxu3  ;;  %v2369_v22 = vadd.f32 %v2368_v45, %v1431_v47 }
 0xc83   :  { %v2382_v5 = vadd.f32 %v2381_v38, %v2369_v22 }
 0xc85   :  { %v2395_v21 = vadd.f32 %v2394_v46, %v2382_v5 }
 0xc87   :  { %v2408_v50 = vadd.f32 %v2407_v39, %v2395_v21 }
 0xc88   :  { %v2370_v4 = vpop.f32.mrf.mxu2 }
 0xc89   :  { %v2396_v41 = vpop.f32.mrf.mxu3 }
 0xc94   :  { %v2433_v49 = vpop.f32.mrf.mxu0 }
 0xc9c   :  { %v2435_v30 = vpop.f32.mrf.mxu0 }
 0xca0   :  { %v2420_v51 = vpop.f32.mrf.mxu2 }
 0xca1   :  { %v2421_v53 = vadd.f32 %v2420_v51, %v2408_v50 }
 0xca3   :  { %v2434_v18 = vadd.f32 %v2433_v49, %v2421_v53 }
 0xca5   :  { %v2439_v10 = vmax.f32 %v2434_v18, 0.0 }
 0xca7   :  { %v2442_v56 = vpack.c.bf16 %v2439_v10, %v2439_v10 }
 0xca8   :  { %v2422_v60 = vpop.f32.mrf.mxu2 }
 0xca9   :  { %2673 = vmatmul.bf16.vlgmr.msrb.gmra.mxu2 %v2442_v56 }
 0xcdc   :  { %v2648_v1 = vpop.f32.mrf.mxu3 }
 0xcdd   :  { %v2649_v7 = vadd.f32 %v3928_v57, %v2648_v1 }
 0xce4   :  { %v2650_v29 = vpop.f32.mrf.mxu3 }
 0xcea   :  { %v2661_v55 = vpop.f32.mrf.mxu1 }
 0xceb   :  { %v2662_v8 = vadd.f32 %v2661_v55, %v2649_v7 }
 0xcf2   :  { %v2663_v3 = vpop.f32.mrf.mxu1 }
 0xd2c   :  { %v2674_v13 = vpop.f32.mrf.mxu2 }
 0xd2d   :  { %v2675_v14 = vadd.f32 %v2674_v13, %v2662_v8 }
 0xd2f   :  { %v2678_v16 = vmax.f32 %v2675_v14, 0.0 }
 0xd31   :  { %v2679_v17 = vpack.c.bf16 %v2678_v16, %v2678_v16 }
 0xd33   :  { %2756 = vmatmul.bf16.vlgmr.msrb.gmra.mxu0 %v2679_v17 }
 0xd34   :  { %v2676_v12 = vpop.f32.mrf.mxu2 }
 0xdb0   :  { %v2757_v36 = vpop.f32.mrf.mxu0 }
 0xdb1   :  { %v2758_v20 = vadd.f32 %v3929_v19, %v2757_v36 }
 0xdb3   :  { %v2761_v40 = vmax.f32 %v2758_v20, 0.0 }
 0xdb5   :  { %v2766_v48 = vmul.f32 %v3930_v23, %v2761_v40 }
 0xdb7   :  { %v2768_v58 = vsel %vm2767_vm3, %v2766_v48, 0.0 }
 0xdb8   :  { %v2759_v24 = vpop.f32.mrf.mxu0  ;;  %2769 = vadd.xlane.f32.xlu0 %v2768_v58 }
 0xe2b   :  { %v2770_v26 = vpop.xlane.xlu0 %2769 }
 0xe2c   :  { %v2775_v27 = vadd.f32 %v3931_v25, %v2770_v26 }
 0xe2e   :  { %v3677_v52 = vmul.f32 -1.442695, %v2775_v27 }
 0xe30   :  { %3970 = vpow2.f32 %v3677_v52 }
 0xe36   :  { %v3971_v61 = vpop.eup %3970 }
 0xe37   :  { %v2779_v28 = vadd.f32 1.0, %v3971_v61 }
 0xe39   :  { %3972 = vrcp.f32 %v2779_v28  ;;  %v2791_v33 = vand.u32 2147483648, %v2779_v28  ;;  %v2789_v38 = vand.u32 2147483647, %v2779_v28  ;;  %vm2785_vm8 = vweird.f32 %v2779_v28 }
 0xe3b   :  { %v2792_v42 = vor.u32 1.1754944e-38, %v2791_v33  ;;  %vm2790_vm10 = vcmp.eq.f32.partialorder %v2789_v38, 8.507059e+37 }
 0xe3f   :  { %v3973_v32 = vpop.eup %3972 }
 0xe40   :  { %v2781_v34 = vmul.f32 %v3973_v32, %v2779_v28  ;;  %vm2786_vm7 = vweird.f32 %v3973_v32 }
 0xe41   :  { %vm2787_vm9 = vmor %vm2785_vm8, %vm2786_vm7 }
 0xe42   :  { %v2782_v35 = vsub.f32 1.0, %v2781_v34 }
 0xe44   :  { %v2783_v37 = vmul.f32 %v3973_v32, %v2782_v35 }
 0xe46   :  { %v2784_v39 = vadd.f32 %v3973_v32, %v2783_v37 }
 0xe48   :  { %v2788_v43 = vsel %vm2787_vm9, %v3973_v32, %v2784_v39 }
 0xe49   :  { %v2793_v44 = vsel %vm2790_vm10, %v2792_v42, %v2788_v43 }
 0xe4a   :  { %2797 = vperm.xlu2 %3915, %v2793_v44  }
 0xea4   :  { %v2798_v54 = vpop.permute.xlu2 %2797 }
 0xea5   :  { %v2799_v45 = vperm.slane %v2798_v54, %v4214_v9 }
 0xea7   :  { %2802 = vst.msk [vmem:[#allocation11] sm:$0x1] %vm2801_vm11, %v2799_v45 }
 0xea8   :  { %2813 = dma.vmem_to_hbm [thread:$0]  %s2809_s19, 16, %s2811_s6, [#allocation4]  }
 0xea9   :  { %4124 = dma.done.wait [#allocation4], 16  }
 0xeaa   :  { %4125 = vsyncadd [#allocation4], 4294967280 }
 0xeab   :  { %2818 = vsyncpa [#allocation3], 1 }
 0xeac   :  { %2819 = vsyncpa [#allocation6], 1 }
 0xead   :  { %2820 = vsyncpa [#allocation9], 1 }
 0xeae   :  { %2821 = vsyncpa [#allocation4], 1 }

</bundles_post_ra>
